<compile_context>
chip_gen: v7x
topology: tpu7x:2x2x1
jax: 0.10.0
libtpu: 0.0.40
codegen_flags: <defaults>
</compile_context>

<pallas_src>
import functools

import jax
import jax.numpy as jnp
from jax.experimental import pallas as pl
from jax.experimental.pallas import tpu as pltpu

_MiB = 1024 * 1024


def _round_up(x, m):
    return (x + m - 1) // m * m


def _biaffine_kernel(x1_ref, x2t_ref, w_ref, o_ref, a_scr, *, out_dim, d2b_pad):
    """One (batch, L1-tile, L2-tile) grid step.

    x1_ref : (1, TL, d1b_pad)        input1 rows (bias col appended, zero-padded)
    x2t_ref: (1, d2b_pad, TJ)        input2^T tile (bias col appended, zero-padded)
    w_ref  : (d1b_pad, out*d2b_pad)  fused Linear weight, zero-padded (inert)
    o_ref  : (1, out, TL, TJ)        lane-dense over the L2 tile
    a_scr  : (TL, out*d2b_pad)       cached first-matmul result (persists over j)
    """
    j = pl.program_id(2)

    # First matmul does not depend on the L2 tile: compute once per (b, i) and
    # cache in VMEM scratch, reuse for every j.
    @pl.when(j == 0)
    def _():
        a_scr[...] = jnp.dot(
            x1_ref[0], w_ref[...],
            preferred_element_type=jnp.float32).astype(a_scr.dtype)

    x2t = x2t_ref[0]                                       # (d2b_pad, TJ), MXU-ready
    for o in range(out_dim):                               # small static loop; 128-aligned slices
        a_o = a_scr[:, o * d2b_pad:(o + 1) * d2b_pad]      # (TL, d2b_pad)
        o_ref[0, o] = jnp.dot(
            a_o, x2t, preferred_element_type=jnp.float32).astype(o_ref.dtype)


def biaffine_forward(input1, input2, weight, *, out_dim, bias_dim=(1, 1),
                     precision="bf16", out_dtype=None, torch_layout=True):
    """BiAffineLayer forward.

    input1: (B, L, in1), input2: (B, L, in2),
    weight: (out*(in2+b2), in1+b1)  -- same shape as nn.Linear.weight.

    precision: "bf16" (MXU-fast, bf16 inputs/output, f32 accumulation) or
               "f32" (bit-accurate vs. the f32 reference).
    torch_layout: True -> (B, L2, L1, out) as in the PyTorch module.
                  False -> lane-dense kernel-native (B, out, L1, L2) (saves a
                  full HBM round-trip of the largest tensor if the consumer
                  can accept/fuse it).
    """
    B, L, in1 = input1.shape
    B2, L2_, in2 = input2.shape
    assert B == B2 and L == L2_
    d1b = in1 + bias_dim[0]
    d2b = in2 + bias_dim[1]

    cdt = jnp.bfloat16 if precision == "bf16" else jnp.float32
    odt = jnp.dtype(out_dtype) if out_dtype is not None else jnp.dtype(cdt)
    in_bytes = jnp.dtype(cdt).itemsize
    out_bytes = odt.itemsize

    # 128-align the contraction dims / per-channel slice width / both L axes so
    # every vreg tile is unmasked, per-o slices are lane-tile aligned, and
    # output stores are lane-dense.  Zero padding is mathematically inert.
    d1b_pad = _round_up(d1b, 128)
    d2b_pad = _round_up(d2b, 128)
    L128 = _round_up(L, 128)

    # ---- generation-aware VMEM budget (v5e/v6e: 128 MiB, v7x: 64 MiB) ------
    try:
        vmem_cap = int(pltpu.get_tpu_info().vmem_capacity_bytes)
    except Exception:
        vmem_cap = 64 * _MiB          # conservative fallback (v7x-sized)
    if not vmem_cap or vmem_cap <= 0:
        vmem_cap = 64 * _MiB
    budget = max(24 * _MiB, min(int(0.72 * vmem_cap), vmem_cap - 24 * _MiB))

    def vmem_estimate(tl, tj):
        return (2 * out_dim * tl * tj * out_bytes          # output double-buffer
                + 2 * tl * d1b_pad * in_bytes              # x1 double-buffer
                + 2 * d2b_pad * tj * in_bytes              # x2t double-buffer
                + 1 * d1b_pad * out_dim * d2b_pad * in_bytes   # weight (single-buffered)
                + tl * out_dim * d2b_pad * in_bytes        # a_scr scratch
                + tl * tj * 4)                             # second-matmul f32 result

    # ---- tile selection: candidates include exact divisors of L128 so that
    # awkward lengths (640, 896, ...) do not fall back to tiny tiles ---------
    def _cands(preferred, cap):
        c = {min(p, L128) for p in preferred}
        d = 128
        while d <= min(cap, L128):
            if L128 % d == 0:
                c.add(d)
            d += 128
        return sorted(c, reverse=True)

    tl_cands = _cands((512, 384, 256, 128), 768)
    tj_cands = _cands((2048, 1024, 512, 256, 128), 2048)

    best = None
    for tl in tl_cands:
        l1p_c = _round_up(L128, tl)
        for tj in tj_cands:
            l2p_c = _round_up(L128, tj)
            if vmem_estimate(tl, tj) > budget:
                continue
            # minimize padded output area (HBM & FLOPs), then grid-step count,
            # then prefer larger second-matmul M.
            key = (l1p_c * l2p_c, (l1p_c // tl) * (l2p_c // tj), -tl)
            if best is None or key < best[0]:
                best = (key, tl, tj, l1p_c, l2p_c)
    if best is None:
        TL, TJ = 128, 128
        l1p, l2p = L128, L128
    else:
        _, TL, TJ, l1p, l2p = best

    est_bytes = vmem_estimate(TL, TJ)
    vmem_limit = int(max(32 * _MiB, min(est_bytes + 16 * _MiB, vmem_cap - 8 * _MiB)))
    vmem_limit = max(vmem_limit, est_bytes + 4 * _MiB)

    # ---- host-side glue (cheap, O(B*L*d) vs. O(B*out*L^2) kernel output) ----
    # TODO(synk): fold the bias-ones columns into rank-1 corrections instead of
    # concat+pad to remove this extra HBM copy of the inputs entirely.
    f32 = jnp.float32
    x1 = input1.astype(f32)
    x2 = input2.astype(f32)
    w = weight.astype(f32)
    if bias_dim[0] > 0:
        x1 = jnp.concatenate([x1, jnp.ones((B, L, bias_dim[0]), f32)], axis=2)
    if bias_dim[1] > 0:
        x2 = jnp.concatenate([x2, jnp.ones((B, L, bias_dim[1]), f32)], axis=2)
    x1 = jnp.pad(x1, ((0, 0), (0, l1p - L), (0, d1b_pad - d1b))).astype(cdt)
    x2 = jnp.pad(x2, ((0, 0), (0, l2p - L), (0, d2b_pad - d2b)))
    x2t = jnp.transpose(x2, (0, 2, 1)).astype(cdt)         # (B, d2b_pad, L2_pad)

    # Linear weight (out*d2b, d1b) -> fused, padded (d1b_pad, out*d2b_pad)
    # W2[m, o*d2b_pad + k] = W[o*d2b + k, m]
    w_r = w.reshape(out_dim, d2b, d1b)
    w_r = jnp.pad(w_r, ((0, 0), (0, d2b_pad - d2b), (0, d1b_pad - d1b)))
    w2 = jnp.transpose(w_r, (2, 0, 1)).reshape(d1b_pad, out_dim * d2b_pad).astype(cdt)

    grid = (B, l1p // TL, l2p // TJ)

    flops = (2 * B * l1p * d1b_pad * out_dim * d2b_pad          # first matmul (once per (b,i))
             + 2 * B * out_dim * l1p * l2p * d2b_pad)           # second matmul
    bytes_accessed = (in_bytes * (B * l1p * d1b_pad                       # x1 once
                                  + B * grid[1] * d2b_pad * l2p          # x2t once per (b,i)
                                  + d1b_pad * out_dim * d2b_pad)         # weight once
                      + out_bytes * B * out_dim * l1p * l2p)             # output writeback

    kernel = functools.partial(_biaffine_kernel, out_dim=out_dim, d2b_pad=d2b_pad)

    def _call(single_buffer_weight):
        w_kwargs = dict(pipeline_mode=pl.Buffered(1)) if single_buffer_weight else {}
        return pl.pallas_call(
            kernel,
            out_shape=jax.ShapeDtypeStruct((B, out_dim, l1p, l2p), odt),
            grid_spec=pltpu.PrefetchScalarGridSpec(
                num_scalar_prefetch=0,
                grid=grid,
                in_specs=[
                    pl.BlockSpec((1, TL, d1b_pad), lambda b, i, j: (b, i, 0)),
                    pl.BlockSpec((1, d2b_pad, TJ), lambda b, i, j: (b, 0, j)),
                    pl.BlockSpec((d1b_pad, out_dim * d2b_pad),
                                 lambda b, i, j: (0, 0), **w_kwargs),
                ],
                out_specs=pl.BlockSpec((1, out_dim, TL, TJ),
                                       lambda b, i, j: (b, 0, i, j)),
                scratch_shapes=[pltpu.VMEM((TL, out_dim * d2b_pad), cdt)],
            ),
            compiler_params=pltpu.CompilerParams(
                dimension_semantics=("parallel", "parallel", "arbitrary"),
                vmem_limit_bytes=vmem_limit),
            cost_estimate=pl.CostEstimate(flops=int(flops), transcendentals=0,
                                          bytes_accessed=int(bytes_accessed)),
        )(x1, x2t, w2)

    try:
        out_oij = _call(True)
    except Exception:
        # pipeline_mode / Buffered(1) not supported on this JAX build; fall back
        # to default double-buffering of the (constant) weight block.
        out_oij = _call(False)

    out_oij = out_oij[:, :, :L, :L]   # drop padding -> (B, out, L1, L2)
    if not torch_layout:
        # Lane-dense kernel-native layout: prefer when the consumer can fuse it
        # (saves a full HBM re-read/re-write of the largest tensor).
        return out_oij
    # PyTorch layout (B, L2, L1, out); kept as host glue (on the narrow output
    # dtype) so the kernel's stores stay lane-dense on L2.
    return jnp.transpose(out_oij, (0, 3, 2, 1))


def _reference_forward(input1, input2, weight, *, out_dim, bias_dim=(1, 1)):
    """Pure-JAX reference mirroring the PyTorch forward exactly (f32)."""
    B, L, _ = input1.shape
    d2b = input2.shape[-1] + bias_dim[1]
    x1 = jnp.concatenate([input1, jnp.ones((B, L, bias_dim[0]), input1.dtype)], 2)
    x2 = jnp.concatenate([input2, jnp.ones((B, L, bias_dim[1]), input2.dtype)], 2)
    affine = jnp.einsum("blm,nm->bln", x1, weight)           # Linear, no bias
    affine = affine.reshape(B, L * out_dim, d2b)
    s = jnp.einsum("bpk,bjk->bpj", affine, x2)               # bmm with x2^T
    s = jnp.transpose(s, (0, 2, 1))
    return s.reshape(B, L, L, out_dim)


if __name__ == "__main__":
    # Small, deterministic setup.
    B, L = 2, 8
    IN1, IN2, OUT = 32, 32, 4
    BIAS = (1, 1)
    D1B = IN1 + BIAS[0]
    D2B = IN2 + BIAS[1]

    key = jax.random.PRNGKey(0)
    k1, k2, kw = jax.random.split(key, 3)
    input1 = jax.random.normal(k1, (B, L, IN1), dtype=jnp.float32)
    input2 = jax.random.normal(k2, (B, L, IN2), dtype=jnp.float32)
    # nn.Linear weight shape: (out * (in2+b2), in1+b1); deterministic init.
    weight = 0.1 * jax.random.normal(kw, (OUT * D2B, D1B), dtype=jnp.float32)

    ref = _reference_forward(input1, input2, weight, out_dim=OUT, bias_dim=BIAS)

    # Exact f32 path — tight check against the reference.
    out_f32 = biaffine_forward(input1, input2, weight, out_dim=OUT,
                               bias_dim=BIAS, precision="f32")
    out_f32 = jax.block_until_ready(out_f32)
    assert out_f32.shape == (B, L, L, OUT), out_f32.shape
    assert jnp.allclose(out_f32, ref, atol=1e-4, rtol=1e-4), "f32 mismatch vs reference"

    # Fast bf16-MXU / bf16-output path — looser tolerance (input rounding).
    out_bf16 = biaffine_forward(input1, input2, weight, out_dim=OUT,
                                bias_dim=BIAS, precision="bf16")
    out_bf16 = jax.block_until_ready(out_bf16)
    assert out_bf16.shape == (B, L, L, OUT), out_bf16.shape
    assert jnp.allclose(out_bf16.astype(jnp.float32), ref, atol=0.3, rtol=0.06), \
        "bf16 mismatch vs reference"

    print("KERNEL_OK")
</pallas_src>

<mosaic_0001>
module attributes {stable_mosaic.version = 11 : i64} {
  func.func @_biaffine_kernel(%arg0: i32, %arg1: i32, %arg2: i32, %arg3: memref<1x128x128xf32, #tpu.memory_space<vmem>>, %arg4: memref<1x128x128xf32, #tpu.memory_space<vmem>>, %arg5: memref<128x512xf32, #tpu.memory_space<vmem>>, %arg6: memref<1x4x128x128xf32, #tpu.memory_space<vmem>>, %arg7: memref<128x512xf32, #tpu.memory_space<vmem>>) attributes {dimension_semantics = [#tpu.dimension_semantics<parallel>, #tpu.dimension_semantics<parallel>, #tpu.dimension_semantics<arbitrary>], iteration_bounds = array<i64: 2, 1, 1>, scalar_prefetch = 0 : i64, scratch_operands = 1 : i64, tpu.core_type = #tpu.core_type<tc>, window_params = [{transform_indices = @transform_0, window_bounds = array<i64: 1, 128, 128>}, {transform_indices = @transform_1, window_bounds = array<i64: 1, 128, 128>}, {pipeline_mode = #tpu.pipeline_mode<synchronous>, transform_indices = @transform_2, window_bounds = array<i64: 128, 512>}, {transform_indices = @transform_3, window_bounds = array<i64: 1, 4, 128, 128>}]} {
    %c0_i32 = arith.constant 0 : i32
    %0 = arith.cmpi eq, %arg2, %c0_i32 : i32
    %1 = arith.extui %0 : i1 to i32
    %c0_i32_0 = arith.constant 0 : i32
    %2 = arith.cmpi ne, %1, %c0_i32_0 : i32
    scf.if %2 {
      %c0_24 = arith.constant 0 : index
      %c0_25 = arith.constant 0 : index
      %c0_26 = arith.constant 0 : index
      %25 = vector.load %arg3[%c0_24, %c0_25, %c0_26] : memref<1x128x128xf32, #tpu.memory_space<vmem>>, vector<1x128x128xf32>
      %26 = vector.shape_cast %25 : vector<1x128x128xf32> to vector<128x128xf32>
      %c0_27 = arith.constant 0 : index
      %c0_28 = arith.constant 0 : index
      %27 = vector.load %arg5[%c0_27, %c0_28] : memref<128x512xf32, #tpu.memory_space<vmem>>, vector<128x512xf32>
      %cst_29 = arith.constant dense<0.000000e+00> : vector<128x512xf32>
      %28 = tpu.matmul %26, %27, %cst_29 {dimension_numbers = #tpu.dot_dimension_numbers<[1], [0], [0], [1], [0, 0, 1, 1], [], []>} : vector<128x128xf32>, vector<128x512xf32>, vector<128x512xf32> -> vector<128x512xf32>
      %c0_30 = arith.constant 0 : index
      %c0_31 = arith.constant 0 : index
      %29 = vector.load %arg7[%c0_30, %c0_31] : memref<128x512xf32, #tpu.memory_space<vmem>>, vector<128x512xf32>
      tpu.vector_store %arg7[%c0_30, %c0_31], %28 {strides = array<i32>} : memref<128x512xf32, #tpu.memory_space<vmem>>, vector<128x512xf32>,
    } else {
    }
    %c0 = arith.constant 0 : index
    %c0_1 = arith.constant 0 : index
    %c0_2 = arith.constant 0 : index
    %3 = vector.load %arg4[%c0, %c0_1, %c0_2] : memref<1x128x128xf32, #tpu.memory_space<vmem>>, vector<1x128x128xf32>
    %4 = vector.shape_cast %3 : vector<1x128x128xf32> to vector<128x128xf32>
    %c0_3 = arith.constant 0 : index
    %c0_4 = arith.constant 0 : index
    %5 = vector.load %arg7[%c0_3, %c0_4] : memref<128x512xf32, #tpu.memory_space<vmem>>, vector<128x128xf32>
    %cst = arith.constant dense<0.000000e+00> : vector<128x128xf32>
    %6 = tpu.matmul %5, %4, %cst {dimension_numbers = #tpu.dot_dimension_numbers<[1], [0], [0], [1], [0, 0, 1, 1], [], []>} : vector<128x128xf32>, vector<128x128xf32>, vector<128x128xf32> -> vector<128x128xf32>
    %c0_5 = arith.constant 0 : index
    %c0_6 = arith.constant 0 : index
    %c0_7 = arith.constant 0 : index
    %c0_8 = arith.constant 0 : index
    %7 = vector.load %arg6[%c0_5, %c0_6, %c0_7, %c0_8] : memref<1x4x128x128xf32, #tpu.memory_space<vmem>>, vector<1x1x128x128xf32>
    %8 = vector.shape_cast %7 : vector<1x1x128x128xf32> to vector<128x128xf32>
    %9 = vector.shape_cast %6 : vector<128x128xf32> to vector<1x1x128x128xf32>
    tpu.vector_store %arg6[%c0_5, %c0_6, %c0_7, %c0_8], %9 {strides = array<i32>} : memref<1x4x128x128xf32, #tpu.memory_space<vmem>>, vector<1x1x128x128xf32>,
    %c0_9 = arith.constant 0 : index
    %c128 = arith.constant 128 : index
    %10 = vector.load %arg7[%c0_9, %c128] : memref<128x512xf32, #tpu.memory_space<vmem>>, vector<128x128xf32>
    %cst_10 = arith.constant dense<0.000000e+00> : vector<128x128xf32>
    %11 = tpu.matmul %10, %4, %cst_10 {dimension_numbers = #tpu.dot_dimension_numbers<[1], [0], [0], [1], [0, 0, 1, 1], [], []>} : vector<128x128xf32>, vector<128x128xf32>, vector<128x128xf32> -> vector<128x128xf32>
    %c0_11 = arith.constant 0 : index
    %c1 = arith.constant 1 : index
    %c0_12 = arith.constant 0 : index
    %c0_13 = arith.constant 0 : index
    %12 = vector.load %arg6[%c0_11, %c1, %c0_12, %c0_13] : memref<1x4x128x128xf32, #tpu.memory_space<vmem>>, vector<1x1x128x128xf32>
    %13 = vector.shape_cast %12 : vector<1x1x128x128xf32> to vector<128x128xf32>
    %14 = vector.shape_cast %11 : vector<128x128xf32> to vector<1x1x128x128xf32>
    tpu.vector_store %arg6[%c0_11, %c1, %c0_12, %c0_13], %14 {strides = array<i32>} : memref<1x4x128x128xf32, #tpu.memory_space<vmem>>, vector<1x1x128x128xf32>,
    %c0_14 = arith.constant 0 : index
    %c256 = arith.constant 256 : index
    %15 = vector.load %arg7[%c0_14, %c256] : memref<128x512xf32, #tpu.memory_space<vmem>>, vector<128x128xf32>
    %cst_15 = arith.constant dense<0.000000e+00> : vector<128x128xf32>
    %16 = tpu.matmul %15, %4, %cst_15 {dimension_numbers = #tpu.dot_dimension_numbers<[1], [0], [0], [1], [0, 0, 1, 1], [], []>} : vector<128x128xf32>, vector<128x128xf32>, vector<128x128xf32> -> vector<128x128xf32>
    %c0_16 = arith.constant 0 : index
    %c2 = arith.constant 2 : index
    %c0_17 = arith.constant 0 : index
    %c0_18 = arith.constant 0 : index
    %17 = vector.load %arg6[%c0_16, %c2, %c0_17, %c0_18] : memref<1x4x128x128xf32, #tpu.memory_space<vmem>>, vector<1x1x128x128xf32>
    %18 = vector.shape_cast %17 : vector<1x1x128x128xf32> to vector<128x128xf32>
    %19 = vector.shape_cast %16 : vector<128x128xf32> to vector<1x1x128x128xf32>
    tpu.vector_store %arg6[%c0_16, %c2, %c0_17, %c0_18], %19 {strides = array<i32>} : memref<1x4x128x128xf32, #tpu.memory_space<vmem>>, vector<1x1x128x128xf32>,
    %c0_19 = arith.constant 0 : index
    %c384 = arith.constant 384 : index
    %20 = vector.load %arg7[%c0_19, %c384] : memref<128x512xf32, #tpu.memory_space<vmem>>, vector<128x128xf32>
    %cst_20 = arith.constant dense<0.000000e+00> : vector<128x128xf32>
    %21 = tpu.matmul %20, %4, %cst_20 {dimension_numbers = #tpu.dot_dimension_numbers<[1], [0], [0], [1], [0, 0, 1, 1], [], []>} : vector<128x128xf32>, vector<128x128xf32>, vector<128x128xf32> -> vector<128x128xf32>
    %c0_21 = arith.constant 0 : index
    %c3 = arith.constant 3 : index
    %c0_22 = arith.constant 0 : index
    %c0_23 = arith.constant 0 : index
    %22 = vector.load %arg6[%c0_21, %c3, %c0_22, %c0_23] : memref<1x4x128x128xf32, #tpu.memory_space<vmem>>, vector<1x1x128x128xf32>
    %23 = vector.shape_cast %22 : vector<1x1x128x128xf32> to vector<128x128xf32>
    %24 = vector.shape_cast %21 : vector<128x128xf32> to vector<1x1x128x128xf32>
    tpu.vector_store %arg6[%c0_21, %c3, %c0_22, %c0_23], %24 {strides = array<i32>} : memref<1x4x128x128xf32, #tpu.memory_space<vmem>>, vector<1x1x128x128xf32>,
    return
  }
  func.func @transform_0(%arg0: i32, %arg1: i32, %arg2: i32) -> (i32, i32, i32) {
    %c0_i32 = arith.constant 0 : i32
    %c0_i32_0 = arith.constant 0 : i32
    return %arg0, %arg1, %c0_i32 : i32, i32, i32
  }
  func.func @transform_1(%arg0: i32, %arg1: i32, %arg2: i32) -> (i32, i32, i32) {
    %c0_i32 = arith.constant 0 : i32
    %c0_i32_0 = arith.constant 0 : i32
    return %arg0, %c0_i32, %arg2 : i32, i32, i32
  }
  func.func @transform_2(%arg0: i32, %arg1: i32, %arg2: i32) -> (i32, i32) {
    %c0_i32 = arith.constant 0 : i32
    %c0_i32_0 = arith.constant 0 : i32
    %c0_i32_1 = arith.constant 0 : i32
    return %c0_i32, %c0_i32_0 : i32, i32
  }
  func.func @transform_3(%arg0: i32, %arg1: i32, %arg2: i32) -> (i32, i32, i32, i32) {
    %c0_i32 = arith.constant 0 : i32
    %c0_i32_0 = arith.constant 0 : i32
    return %arg0, %c0_i32, %arg1, %arg2 : i32, i32, i32, i32
  }
}

module attributes {stable_mosaic.version = 11 : i64} {
  func.func @_biaffine_kernel(%arg0: i32, %arg1: i32, %arg2: i32, %arg3: memref<1x128x128xf32, #tpu.memory_space<vmem>>, %arg4: memref<1x128x128xf32, #tpu.memory_space<vmem>>, %arg5: memref<128x512xf32, #tpu.memory_space<vmem>>, %arg6: memref<1x4x128x128xf32, #tpu.memory_space<vmem>>, %arg7: memref<128x512xf32, #tpu.memory_space<vmem>>) attributes {dimension_semantics = [#tpu.dimension_semantics<parallel>, #tpu.dimension_semantics<parallel>, #tpu.dimension_semantics<arbitrary>], iteration_bounds = array<i64: 2, 1, 1>, scalar_prefetch = 0 : i64, scratch_operands = 1 : i64, tpu.core_type = #tpu.core_type<tc>, window_params = [{transform_indices = @transform_0, window_bounds = array<i64: 1, 128, 128>}, {transform_indices = @transform_1, window_bounds = array<i64: 1, 128, 128>}, {pipeline_mode = #tpu.pipeline_mode<synchronous>, transform_indices = @transform_2, window_bounds = array<i64: 128, 512>}, {transform_indices = @transform_3, window_bounds = array<i64: 1, 4, 128, 128>}]} {
    %c0_i32 = arith.constant 0 : i32
    %0 = arith.cmpi eq, %arg2, %c0_i32 : i32
    %1 = arith.extui %0 : i1 to i32
    %c0_i32_0 = arith.constant 0 : i32
    %2 = arith.cmpi ne, %1, %c0_i32_0 : i32
    scf.if %2 {
      %c0_24 = arith.constant 0 : index
      %c0_25 = arith.constant 0 : index
      %c0_26 = arith.constant 0 : index
      %25 = vector.load %arg3[%c0_24, %c0_25, %c0_26] : memref<1x128x128xf32, #tpu.memory_space<vmem>>, vector<1x128x128xf32>
      %26 = vector.shape_cast %25 : vector<1x128x128xf32> to vector<128x128xf32>
      %c0_27 = arith.constant 0 : index
      %c0_28 = arith.constant 0 : index
      %27 = vector.load %arg5[%c0_27, %c0_28] : memref<128x512xf32, #tpu.memory_space<vmem>>, vector<128x512xf32>
      %cst_29 = arith.constant dense<0.000000e+00> : vector<128x512xf32>
      %28 = tpu.matmul %26, %27, %cst_29 {dimension_numbers = #tpu.dot_dimension_numbers<[1], [0], [0], [1], [0, 0, 1, 1], [], []>} : vector<128x128xf32>, vector<128x512xf32>, vector<128x512xf32> -> vector<128x512xf32>
      %c0_30 = arith.constant 0 : index
      %c0_31 = arith.constant 0 : index
      %29 = vector.load %arg7[%c0_30, %c0_31] : memref<128x512xf32, #tpu.memory_space<vmem>>, vector<128x512xf32>
      tpu.vector_store %arg7[%c0_30, %c0_31], %28 {strides = array<i32>} : memref<128x512xf32, #tpu.memory_space<vmem>>, vector<128x512xf32>,
    } else {
    }
    %c0 = arith.constant 0 : index
    %c0_1 = arith.constant 0 : index
    %c0_2 = arith.constant 0 : index
    %3 = vector.load %arg4[%c0, %c0_1, %c0_2] : memref<1x128x128xf32, #tpu.memory_space<vmem>>, vector<1x128x128xf32>
    %4 = vector.shape_cast %3 : vector<1x128x128xf32> to vector<128x128xf32>
    %c0_3 = arith.constant 0 : index
    %c0_4 = arith.constant 0 : index
    %5 = vector.load %arg7[%c0_3, %c0_4] : memref<128x512xf32, #tpu.memory_space<vmem>>, vector<128x128xf32>
    %cst = arith.constant dense<0.000000e+00> : vector<128x128xf32>
    %6 = tpu.matmul %5, %4, %cst {dimension_numbers = #tpu.dot_dimension_numbers<[1], [0], [0], [1], [0, 0, 1, 1], [], []>} : vector<128x128xf32>, vector<128x128xf32>, vector<128x128xf32> -> vector<128x128xf32>
    %c0_5 = arith.constant 0 : index
    %c0_6 = arith.constant 0 : index
    %c0_7 = arith.constant 0 : index
    %c0_8 = arith.constant 0 : index
    %7 = vector.load %arg6[%c0_5, %c0_6, %c0_7, %c0_8] : memref<1x4x128x128xf32, #tpu.memory_space<vmem>>, vector<1x1x128x128xf32>
    %8 = vector.shape_cast %7 : vector<1x1x128x128xf32> to vector<128x128xf32>
    %9 = vector.shape_cast %6 : vector<128x128xf32> to vector<1x1x128x128xf32>
    tpu.vector_store %arg6[%c0_5, %c0_6, %c0_7, %c0_8], %9 {strides = array<i32>} : memref<1x4x128x128xf32, #tpu.memory_space<vmem>>, vector<1x1x128x128xf32>,
    %c0_9 = arith.constant 0 : index
    %c128 = arith.constant 128 : index
    %10 = vector.load %arg7[%c0_9, %c128] : memref<128x512xf32, #tpu.memory_space<vmem>>, vector<128x128xf32>
    %cst_10 = arith.constant dense<0.000000e+00> : vector<128x128xf32>
    %11 = tpu.matmul %10, %4, %cst_10 {dimension_numbers = #tpu.dot_dimension_numbers<[1], [0], [0], [1], [0, 0, 1, 1], [], []>} : vector<128x128xf32>, vector<128x128xf32>, vector<128x128xf32> -> vector<128x128xf32>
    %c0_11 = arith.constant 0 : index
    %c1 = arith.constant 1 : index
    %c0_12 = arith.constant 0 : index
    %c0_13 = arith.constant 0 : index
    %12 = vector.load %arg6[%c0_11, %c1, %c0_12, %c0_13] : memref<1x4x128x128xf32, #tpu.memory_space<vmem>>, vector<1x1x128x128xf32>
    %13 = vector.shape_cast %12 : vector<1x1x128x128xf32> to vector<128x128xf32>
    %14 = vector.shape_cast %11 : vector<128x128xf32> to vector<1x1x128x128xf32>
    tpu.vector_store %arg6[%c0_11, %c1, %c0_12, %c0_13], %14 {strides = array<i32>} : memref<1x4x128x128xf32, #tpu.memory_space<vmem>>, vector<1x1x128x128xf32>,
    %c0_14 = arith.constant 0 : index
    %c256 = arith.constant 256 : index
    %15 = vector.load %arg7[%c0_14, %c256] : memref<128x512xf32, #tpu.memory_space<vmem>>, vector<128x128xf32>
    %cst_15 = arith.constant dense<0.000000e+00> : vector<128x128xf32>
    %16 = tpu.matmul %15, %4, %cst_15 {dimension_numbers = #tpu.dot_dimension_numbers<[1], [0], [0], [1], [0, 0, 1, 1], [], []>} : vector<128x128xf32>, vector<128x128xf32>, vector<128x128xf32> -> vector<128x128xf32>
    %c0_16 = arith.constant 0 : index
    %c2 = arith.constant 2 : index
    %c0_17 = arith.constant 0 : index
    %c0_18 = arith.constant 0 : index
    %17 = vector.load %arg6[%c0_16, %c2, %c0_17, %c0_18] : memref<1x4x128x128xf32, #tpu.memory_space<vmem>>, vector<1x1x128x128xf32>
    %18 = vector.shape_cast %17 : vector<1x1x128x128xf32> to vector<128x128xf32>
    %19 = vector.shape_cast %16 : vector<128x128xf32> to vector<1x1x128x128xf32>
    tpu.vector_store %arg6[%c0_16, %c2, %c0_17, %c0_18], %19 {strides = array<i32>} : memref<1x4x128x128xf32, #tpu.memory_space<vmem>>, vector<1x1x128x128xf32>,
    %c0_19 = arith.constant 0 : index
    %c384 = arith.constant 384 : index
    %20 = vector.load %arg7[%c0_19, %c384] : memref<128x512xf32, #tpu.memory_space<vmem>>, vector<128x128xf32>
    %cst_20 = arith.constant dense<0.000000e+00> : vector<128x128xf32>
    %21 = tpu.matmul %20, %4, %cst_20 {dimension_numbers = #tpu.dot_dimension_numbers<[1], [0], [0], [1], [0, 0, 1, 1], [], []>} : vector<128x128xf32>, vector<128x128xf32>, vector<128x128xf32> -> vector<128x128xf32>
    %c0_21 = arith.constant 0 : index
    %c3 = arith.constant 3 : index
    %c0_22 = arith.constant 0 : index
    %c0_23 = arith.constant 0 : index
    %22 = vector.load %arg6[%c0_21, %c3, %c0_22, %c0_23] : memref<1x4x128x128xf32, #tpu.memory_space<vmem>>, vector<1x1x128x128xf32>
    %23 = vector.shape_cast %22 : vector<1x1x128x128xf32> to vector<128x128xf32>
    %24 = vector.shape_cast %21 : vector<128x128xf32> to vector<1x1x128x128xf32>
    tpu.vector_store %arg6[%c0_21, %c3, %c0_22, %c0_23], %24 {strides = array<i32>} : memref<1x4x128x128xf32, #tpu.memory_space<vmem>>, vector<1x1x128x128xf32>,
    return
  }
  func.func @transform_0(%arg0: i32, %arg1: i32, %arg2: i32) -> (i32, i32, i32) {
    %c0_i32 = arith.constant 0 : i32
    %c0_i32_0 = arith.constant 0 : i32
    return %arg0, %arg1, %c0_i32 : i32, i32, i32
  }
  func.func @transform_1(%arg0: i32, %arg1: i32, %arg2: i32) -> (i32, i32, i32) {
    %c0_i32 = arith.constant 0 : i32
    %c0_i32_0 = arith.constant 0 : i32
    return %arg0, %c0_i32, %arg2 : i32, i32, i32
  }
  func.func @transform_2(%arg0: i32, %arg1: i32, %arg2: i32) -> (i32, i32) {
    %c0_i32 = arith.constant 0 : i32
    %c0_i32_0 = arith.constant 0 : i32
    %c0_i32_1 = arith.constant 0 : i32
    return %c0_i32, %c0_i32_0 : i32, i32
  }
  func.func @transform_3(%arg0: i32, %arg1: i32, %arg2: i32) -> (i32, i32, i32, i32) {
    %c0_i32 = arith.constant 0 : i32
    %c0_i32_0 = arith.constant 0 : i32
    return %arg0, %c0_i32, %arg1, %arg2 : i32, i32, i32, i32
  }
}

</mosaic_0001>

<bundles_post_ra>
// kernel: tpu_custom_call.1
= control target key start
LH: loop header
LB: loop body
LE: loop exit
PB: predicated region body
PF: predicated region fallthrough
CT: control target
= control target key end

     0   :  { %s3046_s0 = inlined_call_operand.hbm [shape: f32[2,128,128], index: 0, kind: input, shape index: {}]   ;;  %s3047_s1 = inlined_call_operand.hbm [shape: f32[2,128,128], index: 1, kind: input, shape index: {}]   ;;  %s3048_s2 = inlined_call_operand.hbm [shape: f32[128,512], index: 2, kind: input, shape index: {}]   ;;  %s3049_s3 = inlined_call_operand.hbm [shape: f32[2,4,128,128], index: 3, kind: output, shape index: {}]  }
   0x1   :  { %3053 = sst [smem:[#allocation14_spill]] %s3046_s0 }
   0x2   :  { %3054 = sst [smem:[#allocation15_spill]] %s3048_s2 }
   0x3   :  { %8 = vsyncpa [#allocation4], 0 }
   0x4   :  { %10 = vsyncpa [#allocation4 + $0x1], 0 }
   0x5   :  { %11 = vsyncpa [#allocation7], 0 }
   0x6   :  { %13 = vsyncpa [#allocation7 + $0x1], 0 }
   0x7   :  { %14 = vsyncpa [#allocation5], 0 }
   0x8   :  { %16 = vsyncpa [#allocation5 + $0x1], 0  ;;  %s2526_s12 = smov 0   ;;  %s2528_s13 = smov 0  }
   0x9   :  { %s2530_s14 = smov 0   ;;  %s2532_s15 = smov 0  }
   0xa   :  { %s2534_s16 = smov 0   ;;  %s2536_s17 = smov 0  }
   0xb LB: > { %s2557_s18 = sadd.s32 4294967295, %s2493_s17   ;;  %s1615_s19 = sadd.s32 4294967294, %s2493_s17   ;;  %s2493_s17 = sphi %s2536_s17, %s22_s17   ;;  %s2489_s16 = sphi %s2534_s16, %s3075_s16   ;;  %s2485_s15 = sphi %s2532_s15, %s3074_s15   ;;  %s2481_s14 = sphi %s2530_s14, %s3073_s14   ;;  %s2477_s13 = sphi %s2528_s13, %s3072_s13   ;;  %s2473_s12 = sphi %s2526_s12, %s3071_s12  }
   0xc   : > { %p63_p0 = scmp.ne.s32.totalorder %s2477_s13, %s2473_s12  ;;  %p3050_p1 = scmp.eq.s32.totalorder %s2557_s18, 0 }
   0xd   : > { %p146_p3 = scmp.eq.s32.totalorder %s1615_s19, 1  ;;  %p1616_p5 = scmp.ge.s32.totalorder %s2493_s17, 1 }
   0xe   : > { %p2566_p4 = por %p3050_p1, %p63_p0  ;;  %p153_p7 = scmp.lt.s32.totalorder %s2493_s17, 3 }
   0xf   : > { %p2571_p6 = por %p146_p3, %p63_p0  ;;  %s2495_s23 = smov [#allocation8]  }
  0x10   : > { %s3055_s20 = scalar_select %p2566_p4, 1, 0 }
  0x11   : > { %s3056_s21 = scalar_select %p2571_p6, 1, 0 }
  0x12   : > { %p2576_p8 = pnand %p1616_p5, %p153_p7  ;;  %s165_s24 = sshll.u32 %s2495_s23, 4  ;;  %s166_s24 = int_to_ptr.vmem [resolvable:$true] %s165_s24 }
  0x13   : > { %s41_s26 = sadd.s32 1, %s2489_s16  ;;  %s3059_s2 = sld [smem:[#allocation15_spill]] }
  0x14   : > { %s3057_s22 = scalar_select %p2576_p8, 1, 0 }
  0x15   : > { %p2240_p9 = pneg %p2576_p8 }
  0x17   : > { %p2585_p11 = pnand %p2240_p9, %p3050_p1 }
  0x19   : > { %s2315_s29 = scalar_lea.hbm %s3059_s2, 8192  ;;  %p2317_p13 = pneg %p2585_p11 }
  0x1a   : > { %p2316_p12 = scmp.ne.s32.totalorder %s3059_s2, %s2315_s29  ;;  %p2322_p5 = scmp.lt.u32.totalorder %s2315_s29, %s3059_s2 }
  0x1c   : > { %p2318_p0 = pnand %p2317_p13, %p2316_p12 }
  0x1e   : > { %p2319_p3 = pneg %p2318_p0 }
  0x20   : > { %p2324_p7 = pnand %p2322_p5, %p2319_p3 }
  0x22   : > { %2327 = shalt.err (!%p2324_p7)
}
  0x23   : > { %s2328_s7 = scalar_lea.vmem %s166_s24, 8192  ;;  %p2336_p2 = scmp.lt.s32.totalorder %s166_s24, %s166_s24 }
  0x24   : > { %p2329_p9 = scmp.ne.s32.totalorder %s166_s24, %s2328_s7  ;;  %p2337_p6 = scmp.lt.s32.totalorder %s2328_s7, %s2328_s7 }
  0x26   : > { %p2331_p10 = pnand %p2329_p9, %p2317_p13  ;;  %p2338_p4 = por %p2337_p6, %p2336_p2 }
  0x28   : > { %p2332_p1 = pneg %p2331_p10 }
  0x2a   : > { %p2339_p8 = pnand %p2338_p4, %p2332_p1 }
  0x2c   : > { %2342 = shalt.err (!%p2339_p8)
}
  0x2d   : > { %s2496_s8 = smov 512   ;;  %s2497_s9 = smov 32  }
  0x2e   : > { %2243 = dma.hbm_to_vmem [thread:$0]  (!%p2585_p11), %s3059_s2, 8192, %s166_s24, [#allocation7], %s2496_s8, %s2496_s8, %s2497_s9  }
  0x2f   : > { %p43_p1 = scmp.ge.s32.totalorder %s41_s26, 2  ;;  %s50_s19 = sadd.s32 1, %s2481_s14 }
  0x30   : > { %p57_p2 = scmp.ne.s32.totalorder %s2481_s14, %s2477_s13  ;;  %p58_p4 = scmp.eq.s32.totalorder %s2493_s17, 0 }
  0x31   : > { %s3077_s26 = smov (%p43_p1, %s41_s26), 0  ;;  %p3061_p8 = scmp.eq.s32.totalorder %s2557_s18, 1 }
  0x32   : > { %p2612_p6 = por %p58_p4, %p57_p2  ;;  %s45_s27 = ssub.s32 %s2489_s16, %s3077_s26 }
  0x33   : > { %p2618_p10 = por %p3061_p8, %p57_p2  ;;  %p2256_p12 = scmp.lt.s32.totalorder %s2493_s17, 2 }
  0x34   : > { %p48_p11 = scmp.eq.s32.totalorder %s45_s27, 0  ;;  %s179_s24 = sand.u32 1, %s2481_s14  }
  0x35   : > { %s2626_s28 = sshll.u32 %s179_s24, 7  ;;  %s1683_s30 = sshll.u32 %s2489_s16, 11 }
  0x36   : > { %s2629_s29 = scalar_select %p48_p11, %s2481_s14, %s50_s19  }
  0x37   : > { %s3063_s0 = sld [smem:[#allocation14_spill]]  ;;  %s183_s7 = scalar_lea.vmem [#allocation3], %s2626_s28 }
  0x38   : > { %s192_s8 = sshll.u32 %s183_s7, 4  ;;  %p2644_p13 = pnand %p2256_p12, %p2612_p6  ;;  %s2640_s8 = int_to_ptr.vmem [resolvable:$true] %s192_s8 }
  0x39   : > { %s2648_s10 = scalar_lea.sflag [#allocation4], %s179_s24 }
  0x3a   : > { %p2345_p3 = pneg %p2644_p13 }
  0x3d   : > { %s2637_s6 = scalar_lea.hbm %s3063_s0, %s1683_s30  ;;  %s2348_s23 = scalar_lea.hbm %s3063_s0, 4096 }
  0x3e   : > { %s2343_s11 = scalar_lea.hbm %s2637_s6, 2048  ;;  %p2349_p9 = scmp.lt.u32.totalorder %s2637_s6, %s3063_s0 }
  0x3f   : > { %p2344_p0 = scmp.ne.s32.totalorder %s2637_s6, %s2343_s11  ;;  %p2350_p1 = scmp.lt.u32.totalorder %s2348_s23, %s2343_s11 }
  0x40   : > { %p2352_p4 = scmp.lt.u32.totalorder %s2343_s11, %s2637_s6 }
  0x41   : > { %p2346_p5 = pnand %p2345_p3, %p2344_p0  ;;  %p2351_p2 = por %p2350_p1, %p2349_p9 }
  0x43   : > { %p2347_p7 = pneg %p2346_p5  ;;  %p2353_p6 = por %p2352_p4, %p2351_p2 }
  0x45   : > { %p2354_p8 = pnand %p2353_p6, %p2347_p7 }
  0x47   : > { %2357 = shalt.err (!%p2354_p8)
}
  0x48   : > { %s2358_s24 = scalar_lea.vmem %s2640_s8, 2048  ;;  %s2498_s7 = smov [#allocation3]  }
  0x49   : > { %p2359_p12 = scmp.ne.s32.totalorder %s2640_s8, %s2358_s24  ;;  %s2363_s19 = sshll.u32 %s2498_s7, 4  ;;  %s2364_s19 = int_to_ptr.vmem [resolvable:$false] %s2363_s19 }
  0x4a   : > { %s2365_s27 = scalar_lea.vmem %s2364_s19, 4096  ;;  %p2366_p5 = scmp.lt.s32.totalorder %s2640_s8, %s2364_s19 }
  0x4b   : > { %p2361_p11 = pnand %p2359_p12, %p2345_p3  ;;  %p2367_p9 = scmp.lt.s32.totalorder %s2365_s27, %s2358_s24 }
  0x4d   : > { %p2362_p0 = pneg %p2361_p11  ;;  %p2368_p1 = por %p2367_p9, %p2366_p5 }
  0x4f   : > { %p2369_p2 = pnand %p2368_p1, %p2362_p0 }
  0x51   : > { %2372 = shalt.err (!%p2369_p2)
}
  0x52   : > { %s2499_s11 = smov 128   ;;  %s2500_s23 = smov 8  }
  0x53   : > { %2247 = dma.hbm_to_vmem [thread:$0]  (!%p2644_p13), %s2637_s6, 2048, %s2640_s8, %s2648_s10, %s2499_s11, %s2499_s11, %s2500_s23  }
  0x54   : > { %s2684_s24 = scalar_lea.hbm %s3047_s1, %s1683_s30  ;;  %s206_s7 = scalar_lea.vmem [#allocation6], %s2626_s28 }
  0x55   : > { %s214_s19 = sshll.u32 %s206_s7, 4  ;;  %s202_s27 = sand.u32 1, %s2493_s17   ;;  %s2687_s19 = int_to_ptr.vmem [resolvable:$true] %s214_s19 }
  0x56   : > { %s2690_s0 = scalar_lea.sflag [#allocation7], %s202_s27  ;;  %s2373_s2 = scalar_lea.hbm %s2684_s24, 2048 }
  0x57   : > { %p2374_p7 = scmp.ne.s32.totalorder %s2684_s24, %s2373_s2  ;;  %s2378_s8 = scalar_lea.hbm %s3047_s1, 4096 }
  0x58   : > { %p2379_p8 = scmp.lt.u32.totalorder %s2684_s24, %s3047_s1  ;;  %p2380_p12 = scmp.lt.u32.totalorder %s2378_s8, %s2373_s2 }
  0x59   : > { %p2376_p4 = pnand %p2374_p7, %p2345_p3  ;;  %p2382_p0 = scmp.lt.u32.totalorder %s2373_s2, %s2684_s24 }
  0x5a   : > { %p2381_p11 = por %p2380_p12, %p2379_p8 }
  0x5b   : > { %p2377_p6 = pneg %p2376_p4 }
  0x5c   : > { %p2383_p5 = por %p2382_p0, %p2381_p11 }
  0x5e   : > { %p2384_p9 = pnand %p2383_p5, %p2377_p6 }
  0x60   : > { %2387 = shalt.err (!%p2384_p9)
}
  0x61   : > { %s2388_s28 = scalar_lea.vmem %s2687_s19, 2048  ;;  %s2501_s5 = smov [#allocation6]  }
  0x62   : > { %p2389_p1 = scmp.ne.s32.totalorder %s2687_s19, %s2388_s28  ;;  %s2393_s7 = sshll.u32 %s2501_s5, 4  ;;  %s2394_s7 = int_to_ptr.vmem [resolvable:$false] %s2393_s7 }
  0x63   : > { %s2395_s27 = scalar_lea.vmem %s2394_s7, 4096  ;;  %p2396_p4 = scmp.lt.s32.totalorder %s2687_s19, %s2394_s7 }
  0x64   : > { %p2391_p2 = pnand %p2389_p1, %p2345_p3  ;;  %p2397_p8 = scmp.lt.s32.totalorder %s2395_s27, %s2388_s28 }
  0x66   : > { %p2392_p7 = pneg %p2391_p2  ;;  %p2398_p12 = por %p2397_p8, %p2396_p4 }
  0x68   : > { %p2399_p11 = pnand %p2398_p12, %p2392_p7 }
  0x6a   : > { %2402 = shalt.err (!%p2399_p11)
}
  0x6b   : > { %2250 = dma.hbm_to_vmem [thread:$0]  (!%p2644_p13), %s2684_s24, 2048, %s2687_s19, %s2690_s0, %s2499_s11, %s2499_s11, %s2500_s23  }
  0x6c   : > { %p3065_p3 = scmp.ne.s32.totalorder %s3057_s22, 0 }
  0x6d   : > { %s2722_s2 = sand.u32 (!%p3065_p3), 1, %s2477_s13   ;;  %p3066_p6 = scmp.ne.s32.totalorder (!%p3065_p3), %s3055_s20, 0 }
  0x6e   : > { %226 = sbr.rel (%p3065_p3) target bundleno = 693 (0x2b5), region = 32  ;;  %s1626_s6 = sshll.u32 (!%p3065_p3), %s2722_s2, 7 }
  0x6f   : > { %s229_s30 = scalar_lea.sflag (!%p3065_p3), [#allocation4], %s2722_s2  ;;  %s2726_s8 = scalar_lea.vmem (!%p3065_p3), [#allocation3], %s1626_s6 }
  0x75   : > { %2456 = dma.done.wait (%p3066_p6), %s229_s30, 2048  }
  0x76   : > { %2458 = vsyncadd (%p3066_p6), %s229_s30, 4294965248  ;;  %s237_s0 = sand.u32 1, %s2557_s18   ;;  %s2733_s9 = scalar_lea.vmem [#allocation6], %s1626_s6 }
  0x77   : > { %s238_s22 = scalar_lea.sflag [#allocation7], %s237_s0 }
  0x78   : > { %2460 = dma.done.wait (%p3066_p6), %s238_s22, 2048  }
  0x79   : > { %2462 = vsyncadd (%p3066_p6), %s238_s22, 4294965248  ;;  %p3067_p13 = scmp.eq.s32.totalorder %s2557_s18, 0 }
  0x7b   : > { %2464 = dma.done.wait (%p3067_p13), [#allocation7], 8192   ;;  %p3068_p0 = pmov %p3067_p13 }
  0x7c   : > { %v2502_v0 = vmov 0.0   ;;  %v296_v1 = vld [vmem:[#allocation8 + $0x8] sm:$0xff]  ;;  %v295_v3 = vld [vmem:[#allocation8] sm:$0xff]  ;;  %v298_v26 = vld [vmem:[#allocation8 + $0x18] sm:$0xff]  ;;  %s1629_s18 = sshll.u32 %s2722_s2, 9  ;;  %s1685_s11 = sshll.u32 %s2485_s15, 13 }
  0x7d   : > { %2466 = vsyncadd (%p3068_p0), [#allocation7], 4294959104  ;;  %423 = vmatprep.mubr.f32.mxu0 %v2502_v0  ;;  %584 = vmatprep.mubr.f32.mxu1 %v2502_v0  ;;  %v300_v2 = vld [vmem:[#allocation8 + $0x28] sm:$0xff]  ;;  %v299_v5 = vld [vmem:[#allocation8 + $0x20] sm:$0xff]  ;;  %s2924_s20 = scalar_lea.vmem [#allocation9], %s1629_s18  ;;  %s2991_s10 = scalar_lea.hbm %s3049_s3, %s1685_s11 }
  0x7e   : > { %v2038_v4 = vpack.c.bf16 %v300_v2, %v296_v1  ;;  %v304_v6 = vld [vmem:[#allocation8 + $0x48] sm:$0xff]  ;;  %v2040_v8 = vpack.c.bf16 %v299_v5, %v295_v3  ;;  %v303_v10 = vld [vmem:[#allocation8 + $0x40] sm:$0xff]  ;;  %v302_v29 = vld [vmem:[#allocation8 + $0x38] sm:$0xff]  ;;  %s1489_s23 = sshll.u32 %s2924_s20, 4  ;;  %s1473_s15 = scalar_lea.sflag [#allocation5], %s2722_s2  ;;  %s2993_s23 = int_to_ptr.vmem [resolvable:$true] %s1489_s23 }
  0x7f   : > { %v308_v7 = vld [vmem:[#allocation8 + $0x68] sm:$0xff]  ;;  %v307_v11 = vld [vmem:[#allocation8 + $0x60] sm:$0xff]  ;;  %v297_v30 = vld [vmem:[#allocation8 + $0x10] sm:$0xff]  ;;  %v2070_v32 = vpack.c.bf16 %v302_v29, %v298_v26  ;;  %s2403_s4 = scalar_lea.vmem %s2993_s23, 8192  ;;  %s2503_s28 = smov [#allocation9]  }
  0x80   : > { %v2042_v9 = vpack.c.bf16 %v308_v7, %v304_v6  ;;  %v312_v12 = vld [vmem:[#allocation8 + $0x88] sm:$0xff]  ;;  %2039 = vmatprep.subr.bf16.mxu0 %v2038_v4  ;;  %v2044_v14 = vpack.c.bf16 %v307_v11, %v303_v10  ;;  %v311_v16 = vld [vmem:[#allocation8 + $0x80] sm:$0xff]  ;;  %v301_v33 = vld [vmem:[#allocation8 + $0x30] sm:$0xff]  ;;  %p2404_p5 = scmp.ne.s32.totalorder %s2993_s23, %s2403_s4  ;;  %s2407_s5 = sshll.u32 %s2503_s28, 4  ;;  %s2408_s5 = int_to_ptr.vmem [resolvable:$false] %s2407_s5 }
  0x81   : > { %v316_v13 = vld [vmem:[#allocation8 + $0xa8] sm:$0xff]  ;;  %2041 = vmatpush1.bf16.msra.mxu0 %v2040_v8  ;;  %v315_v17 = vld [vmem:[#allocation8 + $0xa0] sm:$0xff]  ;;  %v306_v34 = vld [vmem:[#allocation8 + $0x58] sm:$0xff]  ;;  %v2072_v38 = vpack.c.bf16 %v301_v33, %v297_v30  ;;  %2071 = vmatprep.subr.bf16.mxu1 %v2070_v32  ;;  %s2409_s7 = scalar_lea.vmem %s2408_s5, 16384  ;;  %p2410_p2 = scmp.lt.s32.totalorder %s2993_s23, %s2408_s5 }
  0x82   : > { %2043 = vmatprep.subr.bf16.mxu0 %v2042_v9  ;;  %v2046_v15 = vpack.c.bf16 %v316_v13, %v312_v12  ;;  %v320_v18 = vld [vmem:[#allocation8 + $0xc8] sm:$0xff]  ;;  %v2048_v20 = vpack.c.bf16 %v315_v17, %v311_v16  ;;  %v319_v22 = vld [vmem:[#allocation8 + $0xc0] sm:$0xff]  ;;  %v310_v35 = vld [vmem:[#allocation8 + $0x78] sm:$0xff]  ;;  %p2405_p9 = pnand %p2404_p5, %p2618_p10  ;;  %p2411_p7 = scmp.lt.s32.totalorder %s2409_s7, %s2403_s4 }
  0x83   : > { %v324_v19 = vld [vmem:[#allocation8 + $0xe8] sm:$0xff]  ;;  %v323_v23 = vld [vmem:[#allocation8 + $0xe0] sm:$0xff]  ;;  %v2074_v39 = vpack.c.bf16 %v310_v35, %v306_v34  ;;  %v305_v40 = vld [vmem:[#allocation8 + $0x50] sm:$0xff]  ;;  %2073 = vmatpush1.bf16.msra.mxu1 %v2072_v38 }
  0x84   : > { %v2050_v21 = vpack.c.bf16 %v324_v19, %v320_v18  ;;  %v328_v24 = vld [vmem:[#allocation8 + $0x108] sm:$0xff]  ;;  %v327_v27 = vld [vmem:[#allocation8 + $0x100] sm:$0xff]  ;;  %v2052_v31 = vpack.c.bf16 %v323_v23, %v319_v22  ;;  %v309_v41 = vld [vmem:[#allocation8 + $0x70] sm:$0xff]  ;;  %p2406_p1 = pneg %p2405_p9  ;;  %p2412_p4 = por %p2411_p7, %p2410_p2 }
  0x85   : > { %2045 = vmatpush1.bf16.msra.mxu0 %v2044_v14  ;;  %v332_v25 = vld [vmem:[#allocation8 + $0x128] sm:$0xff]  ;;  %v331_v28 = vld [vmem:[#allocation8 + $0x120] sm:$0xff]  ;;  %v314_v43 = vld [vmem:[#allocation8 + $0x98] sm:$0xff]  ;;  %v2076_v45 = vpack.c.bf16 %v309_v41, %v305_v40  ;;  %2075 = vmatprep.subr.bf16.mxu1 %v2074_v39 }
  0x86   : > { %2047 = vmatprep.subr.bf16.mxu0 %v2046_v15  ;;  %v2054_v36 = vpack.c.bf16 %v332_v25, %v328_v24  ;;  %v336_v37 = vld [vmem:[#allocation8 + $0x148] sm:$0xff]  ;;  %v318_v44 = vld [vmem:[#allocation8 + $0xb8] sm:$0xff]  ;;  %v2056_v46 = vpack.c.bf16 %v331_v28, %v327_v27  ;;  %v335_v47 = vld [vmem:[#allocation8 + $0x140] sm:$0xff]  ;;  %p2413_p8 = pnand %p2412_p4, %p2406_p1 }
  0x87   : > { %v340_v42 = vld [vmem:[#allocation8 + $0x168] sm:$0xff]  ;;  %v2078_v48 = vpack.c.bf16 %v318_v44, %v314_v43  ;;  %v313_v49 = vld [vmem:[#allocation8 + $0x90] sm:$0xff]  ;;  %v339_v52 = vld [vmem:[#allocation8 + $0x160] sm:$0xff]  ;;  %2077 = vmatpush1.bf16.msra.mxu1 %v2076_v45 }
  0x88   : > { %v317_v50 = vld [vmem:[#allocation8 + $0xb0] sm:$0xff]  ;;  %v2058_v51 = vpack.c.bf16 %v340_v42, %v336_v37  ;;  %v322_v53 = vld [vmem:[#allocation8 + $0xd8] sm:$0xff]  ;;  %v344_v55 = vld [vmem:[#allocation8 + $0x188] sm:$0xff]  ;;  %v2060_v58 = vpack.c.bf16 %v339_v52, %v335_v47 }
  0x89   : > { %2049 = vmatpush1.bf16.msra.mxu0 %v2048_v20  ;;  %v326_v54 = vld [vmem:[#allocation8 + $0xf8] sm:$0xff]  ;;  %v348_v56 = vld [vmem:[#allocation8 + $0x1a8] sm:$0xff]  ;;  %v2080_v57 = vpack.c.bf16 %v317_v50, %v313_v49  ;;  %v343_v59 = vld [vmem:[#allocation8 + $0x180] sm:$0xff]  ;;  %2079 = vmatprep.subr.bf16.mxu1 %v2078_v48 }
  0x8a   : > { %2051 = vmatprep.subr.bf16.mxu0 %v2050_v21  ;;  %v2082_v60 = vpack.c.bf16 %v326_v54, %v322_v53  ;;  %v321_v61 = vld [vmem:[#allocation8 + $0xd0] sm:$0xff]  ;;  %v2062_v63 = vpack.c.bf16 %v348_v56, %v344_v55  ;;  %v347_v1 = vld [vmem:[#allocation8 + $0x1a0] sm:$0xff]  ;;  %v330_v2 = vld [vmem:[#allocation8 + $0x118] sm:$0xff] }
  0x8b   : > { %v325_v62 = vld [vmem:[#allocation8 + $0xf0] sm:$0xff]  ;;  %v334_v3 = vld [vmem:[#allocation8 + $0x138] sm:$0xff]  ;;  %v352_v4 = vld [vmem:[#allocation8 + $0x1c8] sm:$0xff]  ;;  %2081 = vmatpush1.bf16.msra.mxu1 %v2080_v57  ;;  %v2064_v7 = vpack.c.bf16 %v347_v1, %v343_v59 }
  0x8c   : > { %v356_v5 = vld [vmem:[#allocation8 + $0x1e8] sm:$0xff]  ;;  %v2084_v6 = vpack.c.bf16 %v325_v62, %v321_v61  ;;  %v351_v8 = vld [vmem:[#allocation8 + $0x1c0] sm:$0xff]  ;;  %2083 = vmatprep.subr.bf16.mxu1 %v2082_v60  ;;  %v2086_v9 = vpack.c.bf16 %v334_v3, %v330_v2  ;;  %v329_v10 = vld [vmem:[#allocation8 + $0x110] sm:$0xff] }
  0x8d   : > { %2053 = vmatpush1.bf16.msra.mxu0 %v2052_v31  ;;  %v333_v11 = vld [vmem:[#allocation8 + $0x130] sm:$0xff]  ;;  %v2066_v12 = vpack.c.bf16 %v356_v5, %v352_v4  ;;  %v355_v13 = vld [vmem:[#allocation8 + $0x1e0] sm:$0xff]  ;;  %v338_v14 = vld [vmem:[#allocation8 + $0x158] sm:$0xff] }
  0x8e   : > { %2055 = vmatprep.subr.bf16.mxu0 %v2054_v36  ;;  %v342_v15 = vld [vmem:[#allocation8 + $0x178] sm:$0xff]  ;;  %v745_v16 = vld [vmem:[%s2733_s9] sm:$0xff]  ;;  %v2088_v17 = vpack.c.bf16 %v333_v11, %v329_v10  ;;  %v746_v18 = vld [vmem:[%s2733_s9 + $0x8] sm:$0xff]  ;;  %v2068_v19 = vpack.c.bf16 %v355_v13, %v351_v8 }
  0x8f   : > { %2085 = vmatpush1.bf16.msra.mxu1 %v2084_v6  ;;  %v2090_v20 = vpack.c.bf16 %v342_v15, %v338_v14  ;;  %v337_v21 = vld [vmem:[#allocation8 + $0x150] sm:$0xff]  ;;  %v346_v23 = vld [vmem:[#allocation8 + $0x198] sm:$0xff]  ;;  %v2747_v25 = vpack.c.bf16 %v746_v18, %v745_v16  ;;  %v279_v29 = vld [vmem:[%s2726_s8] sm:$0xff] }
  0x90   : > { %2087 = vmatprep.subr.bf16.mxu1 %v2086_v9  ;;  %v341_v22 = vld [vmem:[#allocation8 + $0x170] sm:$0xff]  ;;  %v350_v24 = vld [vmem:[#allocation8 + $0x1b8] sm:$0xff]  ;;  %v749_v37 = vld [vmem:[%s2733_s9 + $0x20] sm:$0xff] }
  0x91   : > { %2057 = vmatpush1.bf16.msra.mxu0 %v2056_v46  ;;  %v2092_v26 = vpack.c.bf16 %v341_v22, %v337_v21  ;;  %v747_v27 = vld [vmem:[%s2733_s9 + $0x10] sm:$0xff]  ;;  %v748_v28 = vld [vmem:[%s2733_s9 + $0x18] sm:$0xff]  ;;  %v2094_v30 = vpack.c.bf16 %v350_v24, %v346_v23  ;;  %v750_v38 = vld [vmem:[%s2733_s9 + $0x28] sm:$0xff] }
  0x92   : > { %2059 = vmatprep.subr.bf16.mxu0 %v2058_v51  ;;  %v345_v31 = vld [vmem:[#allocation8 + $0x190] sm:$0xff]  ;;  %v354_v33 = vld [vmem:[#allocation8 + $0x1d8] sm:$0xff]  ;;  %v2753_v35 = vpack.c.bf16 %v748_v28, %v747_v27  ;;  %v280_v39 = vld [vmem:[%s2726_s8 + $0x8] sm:$0xff]  ;;  %v2761_v43 = vpack.c.bf16 %v750_v38, %v749_v37 }
  0x93   : > { %2089 = vmatpush1.bf16.msra.mxu1 %v2088_v17  ;;  %v349_v32 = vld [vmem:[#allocation8 + $0x1b0] sm:$0xff]  ;;  %v358_v34 = vld [vmem:[#allocation8 + $0x1f8] sm:$0xff]  ;;  %v753_v49 = vld [vmem:[%s2733_s9 + $0x40] sm:$0xff] }
  0x94   : > { %2091 = vmatprep.subr.bf16.mxu1 %v2090_v20  ;;  %v2096_v36 = vpack.c.bf16 %v349_v32, %v345_v31  ;;  %v2098_v40 = vpack.c.bf16 %v358_v34, %v354_v33  ;;  %v353_v41 = vld [vmem:[#allocation8 + $0x1d0] sm:$0xff]  ;;  %v752_v46 = vld [vmem:[%s2733_s9 + $0x38] sm:$0xff]  ;;  %v754_v50 = vld [vmem:[%s2733_s9 + $0x48] sm:$0xff] }
  0x95   : > { %2061 = vmatpush1.bf16.msra.mxu0 %v2060_v58  ;;  %v357_v42 = vld [vmem:[#allocation8 + $0x1f0] sm:$0xff]  ;;  %v282_v51 = vld [vmem:[%s2726_s8 + $0x18] sm:$0xff]  ;;  %v2778_v52 = vpack.c.bf16 %v754_v50, %v753_v49  ;;  %v283_v55 = vld [vmem:[%s2726_s8 + $0x20] sm:$0xff] }
  0x96   : > { %2063 = vmatprep.subr.bf16.mxu0 %v2062_v63  ;;  %v2100_v44 = vpack.c.bf16 %v357_v42, %v353_v41  ;;  %v751_v45 = vld [vmem:[%s2733_s9 + $0x30] sm:$0xff]  ;;  %v756_v54 = vld [vmem:[%s2733_s9 + $0x58] sm:$0xff]  ;;  %v757_v57 = vld [vmem:[%s2733_s9 + $0x60] sm:$0xff] }
  0x97   : > { %2093 = vmatpush1.bf16.msra.mxu1 %v2092_v26  ;;  %v281_v47 = vld [vmem:[%s2726_s8 + $0x10] sm:$0xff]  ;;  %v2769_v48 = vpack.c.bf16 %v752_v46, %v751_v45  ;;  %v758_v58 = vld [vmem:[%s2733_s9 + $0x68] sm:$0xff]  ;;  %v286_v62 = vld [vmem:[%s2726_s8 + $0x38] sm:$0xff] }
  0x98   : > { %2095 = vmatprep.subr.bf16.mxu1 %v2094_v30  ;;  %v755_v53 = vld [vmem:[%s2733_s9 + $0x50] sm:$0xff]  ;;  %v284_v59 = vld [vmem:[%s2726_s8 + $0x28] sm:$0xff]  ;;  %v2800_v60 = vpack.c.bf16 %v758_v58, %v757_v57  ;;  %v287_v63 = vld [vmem:[%s2726_s8 + $0x40] sm:$0xff] }
  0x99   : > { %2065 = vmatpush1.bf16.msra.mxu0 %v2064_v7  ;;  %v2789_v56 = vpack.c.bf16 %v756_v54, %v755_v53  ;;  %v285_v61 = vld [vmem:[%s2726_s8 + $0x30] sm:$0xff]  ;;  %v288_v1 = vld [vmem:[%s2726_s8 + $0x48] sm:$0xff]  ;;  %v290_v3 = vld [vmem:[%s2726_s8 + $0x58] sm:$0xff] }
  0x9a   : > { %2067 = vmatprep.subr.bf16.mxu0 %v2066_v12  ;;  %v289_v2 = vld [vmem:[%s2726_s8 + $0x50] sm:$0xff]  ;;  %v291_v4 = vld [vmem:[%s2726_s8 + $0x60] sm:$0xff]  ;;  %v292_v5 = vld [vmem:[%s2726_s8 + $0x68] sm:$0xff] }
  0x9b   : > { %2097 = vmatpush1.bf16.msra.mxu1 %v2096_v36  ;;  %v293_v6 = vld [vmem:[%s2726_s8 + $0x70] sm:$0xff]  ;;  %v294_v7 = vld [vmem:[%s2726_s8 + $0x78] sm:$0xff] }
  0x9c   : > { %2099 = vmatprep.subr.bf16.mxu1 %v2098_v40  ;;  %v759_v8 = vld [vmem:[%s2733_s9 + $0x70] sm:$0xff]  ;;  %v760_v9 = vld [vmem:[%s2733_s9 + $0x78] sm:$0xff] }
  0x9d   : > { %2069 = vmatpush1.bf16.msra.mxu0 %v2068_v19  ;;  %v2849_v10 = vpack.c.bf16 %v760_v9, %v759_v8 }
  0x9e   : > { %2103 = vmatprep.subr.bf16.mxu0 %v2747_v25 }
  0x9f   : > { %2101 = vmatpush1.bf16.msra.mxu1 %v2100_v44 }
  0xa0   : > { %424 = vmatmul.mubr.f32.vlgmr.msra.gmra.mrb[0].mxu0 %v279_v29  ;;  %2135 = vmatprep.subr.bf16.mxu1 %v2747_v25 }
  0xa1   : > { %429 = vmatprep.mubr.f32.mxu0 %v2502_v0  ;;  %2105 = vmatpush3.bf16.msra.mxu0 %v2747_v25 }
  0xa2   : > { %2107 = vmatprep.subr.bf16.mxu0 %v2753_v35  ;;  %585 = vmatmul.mubr.f32.vlgmr.msra.gmra.mrb[0].mxu1 %v279_v29 }
  0xa3   : > { %590 = vmatprep.mubr.f32.mxu1 %v2502_v0  ;;  %2137 = vmatpush3.bf16.msra.mxu1 %v2747_v25 }
  0xa4   : > { %430 = vmatmul.mubr.f32.gmra.mrb[2].mxu0 %v280_v39  ;;  %2139 = vmatprep.subr.bf16.mxu1 %v2753_v35 }
  0xa5   : > { %435 = vmatprep.mubr.f32.mxu0 %v2502_v0  ;;  %2109 = vmatpush3.bf16.msra.mxu0 %v2753_v35 }
  0xa6   : > { %2111 = vmatprep.subr.bf16.mxu0 %v2761_v43  ;;  %591 = vmatmul.mubr.f32.gmra.mrb[2].mxu1 %v280_v39 }
  0xa7   : > { %596 = vmatprep.mubr.f32.mxu1 %v2502_v0  ;;  %2141 = vmatpush3.bf16.msra.mxu1 %v2753_v35 }
  0xa8   : > { %436 = vmatmul.mubr.f32.gmra.mrb[4].mxu0 %v281_v47  ;;  %2143 = vmatprep.subr.bf16.mxu1 %v2761_v43 }
  0xa9   : > { %441 = vmatprep.mubr.f32.mxu0 %v2502_v0  ;;  %2113 = vmatpush3.bf16.msra.mxu0 %v2761_v43 }
  0xaa   : > { %2115 = vmatprep.subr.bf16.mxu0 %v2769_v48  ;;  %597 = vmatmul.mubr.f32.gmra.mrb[4].mxu1 %v281_v47 }
  0xab   : > { %602 = vmatprep.mubr.f32.mxu1 %v2502_v0  ;;  %2145 = vmatpush3.bf16.msra.mxu1 %v2761_v43 }
  0xac   : > { %442 = vmatmul.mubr.f32.gmra.mrb[6].mxu0 %v282_v51  ;;  %2147 = vmatprep.subr.bf16.mxu1 %v2769_v48 }
  0xad   : > { %447 = vmatprep.mubr.f32.mxu0 %v2502_v0  ;;  %2117 = vmatpush3.bf16.msra.mxu0 %v2769_v48 }
  0xae   : > { %2119 = vmatprep.subr.bf16.mxu0 %v2778_v52  ;;  %603 = vmatmul.mubr.f32.gmra.mrb[6].mxu1 %v282_v51 }
  0xaf   : > { %608 = vmatprep.mubr.f32.mxu1 %v2502_v0  ;;  %2149 = vmatpush3.bf16.msra.mxu1 %v2769_v48 }
  0xb0   : > { %448 = vmatmul.mubr.f32.gmra.mrb[8].mxu0 %v283_v55  ;;  %2151 = vmatprep.subr.bf16.mxu1 %v2778_v52 }
  0xb1   : > { %453 = vmatprep.mubr.f32.mxu0 %v2502_v0  ;;  %2121 = vmatpush3.bf16.msra.mxu0 %v2778_v52 }
  0xb2   : > { %2123 = vmatprep.subr.bf16.mxu0 %v2789_v56  ;;  %609 = vmatmul.mubr.f32.gmra.mrb[8].mxu1 %v283_v55 }
  0xb3   : > { %614 = vmatprep.mubr.f32.mxu1 %v2502_v0  ;;  %2153 = vmatpush3.bf16.msra.mxu1 %v2778_v52 }
  0xb4   : > { %454 = vmatmul.mubr.f32.gmra.mrb[10].mxu0 %v284_v59  ;;  %2155 = vmatprep.subr.bf16.mxu1 %v2789_v56 }
  0xb5   : > { %459 = vmatprep.mubr.f32.mxu0 %v2502_v0  ;;  %2125 = vmatpush3.bf16.msra.mxu0 %v2789_v56 }
  0xb6   : > { %2127 = vmatprep.subr.bf16.mxu0 %v2800_v60  ;;  %615 = vmatmul.mubr.f32.gmra.mrb[10].mxu1 %v284_v59 }
  0xb7   : > { %620 = vmatprep.mubr.f32.mxu1 %v2502_v0  ;;  %2157 = vmatpush3.bf16.msra.mxu1 %v2789_v56 }
  0xb8   : > { %460 = vmatmul.mubr.f32.gmra.mrb[12].mxu0 %v285_v61  ;;  %2159 = vmatprep.subr.bf16.mxu1 %v2800_v60 }
  0xb9   : > { %465 = vmatprep.mubr.f32.mxu0 %v2502_v0  ;;  %2129 = vmatpush3.bf16.msra.mxu0 %v2800_v60 }
  0xba   : > { %621 = vmatmul.mubr.f32.gmra.mrb[12].mxu1 %v285_v61  ;;  %2131 = vmatprep.subr.bf16.mxu0 %v2849_v10 }
  0xbb   : > { %626 = vmatprep.mubr.f32.mxu1 %v2502_v0  ;;  %2161 = vmatpush3.bf16.msra.mxu1 %v2800_v60 }
  0xbc   : > { %466 = vmatmul.mubr.f32.gmra.mrb[14].mxu0 %v286_v62  ;;  %2163 = vmatprep.subr.bf16.mxu1 %v2849_v10 }
  0xbd   : > { %471 = vmatprep.mubr.f32.mxu0 %v2502_v0  ;;  %2133 = vmatpush3.bf16.msra.mxu0 %v2849_v10 }
  0xbe   : > { %627 = vmatmul.mubr.f32.gmra.mrb[14].mxu1 %v286_v62  ;;  %2167 = vmatprep.subr.bf16.mxu0 %v2747_v25 }
  0xbf   : > { %632 = vmatprep.mubr.f32.mxu1 %v2502_v0  ;;  %2165 = vmatpush3.bf16.msra.mxu1 %v2849_v10 }
  0xc0   : > { %472 = vmatmul.mubr.f32.gmra.mrb[16].mxu0 %v287_v63  ;;  %2199 = vmatprep.subr.bf16.mxu1 %v2747_v25 }
  0xc1   : > { %477 = vmatprep.mubr.f32.mxu0 %v2502_v0 }
  0xc2   : > { %633 = vmatmul.mubr.f32.gmra.mrb[16].mxu1 %v287_v63 }
  0xc3   : > { %638 = vmatprep.mubr.f32.mxu1 %v2502_v0 }
  0xc4   : > { %478 = vmatmul.mubr.f32.gmra.mrb[18].mxu0 %v288_v1 }
  0xc5   : > { %483 = vmatprep.mubr.f32.mxu0 %v2502_v0 }
  0xc6   : > { %639 = vmatmul.mubr.f32.gmra.mrb[18].mxu1 %v288_v1 }
  0xc7   : > { %644 = vmatprep.mubr.f32.mxu1 %v2502_v0 }
  0xc8   : > { %484 = vmatmul.mubr.f32.gmra.mrb[20].mxu0 %v289_v2 }
  0xc9   : > { %489 = vmatprep.mubr.f32.mxu0 %v2502_v0 }
  0xca   : > { %645 = vmatmul.mubr.f32.gmra.mrb[20].mxu1 %v289_v2 }
  0xcb   : > { %650 = vmatprep.mubr.f32.mxu1 %v2502_v0 }
  0xcc   : > { %490 = vmatmul.mubr.f32.gmra.mrb[22].mxu0 %v290_v3 }
  0xcd   : > { %495 = vmatprep.mubr.f32.mxu0 %v2502_v0 }
  0xce   : > { %651 = vmatmul.mubr.f32.gmra.mrb[22].mxu1 %v290_v3 }
  0xcf   : > { %656 = vmatprep.mubr.f32.mxu1 %v2502_v0 }
  0xd0   : > { %496 = vmatmul.mubr.f32.gmra.mrb[24].mxu0 %v291_v4 }
  0xd1   : > { %501 = vmatprep.mubr.f32.mxu0 %v2502_v0 }
  0xd2   : > { %657 = vmatmul.mubr.f32.gmra.mrb[24].mxu1 %v291_v4 }
  0xd3   : > { %662 = vmatprep.mubr.f32.mxu1 %v2502_v0 }
  0xd4   : > { %502 = vmatmul.mubr.f32.gmra.mrb[26].mxu0 %v292_v5 }
  0xd5   : > { %507 = vmatprep.mubr.f32.mxu0 %v2502_v0 }
  0xd6   : > { %663 = vmatmul.mubr.f32.gmra.mrb[26].mxu1 %v292_v5 }
  0xd7   : > { %668 = vmatprep.mubr.f32.mxu1 %v2502_v0 }
  0xd8   : > { %508 = vmatmul.mubr.f32.gmra.mrb[28].mxu0 %v293_v6 }
  0xd9   : > { %513 = vmatprep.mubr.f32.mxu0 %v2502_v0 }
  0xda   : > { %669 = vmatmul.mubr.f32.gmra.mrb[28].mxu1 %v293_v6 }
  0xdb   : > { %674 = vmatprep.mubr.f32.mxu1 %v2502_v0 }
  0xdc   : > { %514 = vmatmul.mubr.f32.gmra.mrb[30].mxu0 %v294_v7 }
  0xde   : > { %675 = vmatmul.mubr.f32.gmra.mrb[30].mxu1 %v294_v7 }
 0x173   : > { %v425_v11 = vpop.f32.mrb[0].mxu0 }
 0x174   : > { %v427_v12 = vpop.f32.mrb[1].mxu0  ;;  %1846 = vmatprep.mubr.f32.mxu0 %v425_v11 }
 0x175   : > { %1902 = vmatprep.mubr.f32.mxu1 %v427_v12  ;;  %v2862_v16 = vpop.f32.mrb[0].mxu1 }
 0x176   : > { %v2866_v18 = vpop.f32.mrb[1].mxu1 }
 0x177   : > { %v431_v0 = vpop.f32.mrb[2].mxu0 }
 0x178   : > { %v433_v13 = vpop.f32.mrb[3].mxu0  ;;  %1847 = vmatmul.mubr.f32.vlgmr.msra.gmra.mrb[32].mxu0 %v431_v0 }
 0x179   : > { %1903 = vmatmul.mubr.f32.vlgmr.msra.gmra.mrb[32].mxu1 %v433_v13  ;;  %2169 = vmatpush3.bf16.msra.mxu0 %v2747_v25  ;;  %v2870_v20 = vpop.f32.mrb[2].mxu1 }
 0x17a   : > { %2201 = vmatpush3.bf16.msra.mxu1 %v2747_v25  ;;  %2171 = vmatprep.subr.bf16.mxu0 %v2753_v35  ;;  %v2874_v22 = vpop.f32.mrb[3].mxu1 }
 0x17b   : > { %v437_v14 = vpop.f32.mrb[4].mxu0  ;;  %2203 = vmatprep.subr.bf16.mxu1 %v2753_v35 }
 0x17c   : > { %v439_v15 = vpop.f32.mrb[5].mxu0  ;;  %1849 = vmatprep.mubr.f32.mxu0 %v437_v14 }
 0x17d   : > { %1905 = vmatprep.mubr.f32.mxu1 %v439_v15  ;;  %2173 = vmatpush3.bf16.msra.mxu0 %v2753_v35  ;;  %v2878_v24 = vpop.f32.mrb[4].mxu1 }
 0x17e   : > { %2205 = vmatpush3.bf16.msra.mxu1 %v2753_v35  ;;  %2175 = vmatprep.subr.bf16.mxu0 %v2761_v43  ;;  %v2882_v26 = vpop.f32.mrb[5].mxu1 }
 0x17f   : > { %v443_v17 = vpop.f32.mrb[6].mxu0  ;;  %2207 = vmatprep.subr.bf16.mxu1 %v2761_v43 }
 0x180   : > { %v445_v19 = vpop.f32.mrb[7].mxu0  ;;  %1850 = vmatmul.mubr.f32.gmra.mrb[34].mxu0 %v443_v17 }
 0x181   : > { %1906 = vmatmul.mubr.f32.gmra.mrb[34].mxu1 %v445_v19  ;;  %2177 = vmatpush3.bf16.msra.mxu0 %v2761_v43  ;;  %v2886_v28 = vpop.f32.mrb[6].mxu1 }
 0x182   : > { %2209 = vmatpush3.bf16.msra.mxu1 %v2761_v43  ;;  %2179 = vmatprep.subr.bf16.mxu0 %v2769_v48  ;;  %v2890_v30 = vpop.f32.mrb[7].mxu1 }
 0x183   : > { %v449_v21 = vpop.f32.mrb[8].mxu0  ;;  %2211 = vmatprep.subr.bf16.mxu1 %v2769_v48 }
 0x184   : > { %v451_v23 = vpop.f32.mrb[9].mxu0  ;;  %1852 = vmatprep.mubr.f32.mxu0 %v449_v21 }
 0x185   : > { %1908 = vmatprep.mubr.f32.mxu1 %v451_v23  ;;  %2181 = vmatpush3.bf16.msra.mxu0 %v2769_v48  ;;  %v2894_v32 = vpop.f32.mrb[8].mxu1 }
 0x186   : > { %2213 = vmatpush3.bf16.msra.mxu1 %v2769_v48  ;;  %2183 = vmatprep.subr.bf16.mxu0 %v2778_v52  ;;  %v2898_v34 = vpop.f32.mrb[9].mxu1 }
 0x187   : > { %v455_v25 = vpop.f32.mrb[10].mxu0  ;;  %2215 = vmatprep.subr.bf16.mxu1 %v2778_v52 }
 0x188   : > { %v457_v27 = vpop.f32.mrb[11].mxu0  ;;  %1853 = vmatmul.mubr.f32.gmra.mrb[36].mxu0 %v455_v25 }
 0x189   : > { %1909 = vmatmul.mubr.f32.gmra.mrb[36].mxu1 %v457_v27  ;;  %2185 = vmatpush3.bf16.msra.mxu0 %v2778_v52  ;;  %v2902_v36 = vpop.f32.mrb[10].mxu1 }
 0x18a   : > { %2217 = vmatpush3.bf16.msra.mxu1 %v2778_v52  ;;  %2187 = vmatprep.subr.bf16.mxu0 %v2789_v56  ;;  %v2906_v38 = vpop.f32.mrb[11].mxu1 }
 0x18b   : > { %v461_v29 = vpop.f32.mrb[12].mxu0  ;;  %2219 = vmatprep.subr.bf16.mxu1 %v2789_v56 }
 0x18c   : > { %v463_v31 = vpop.f32.mrb[13].mxu0  ;;  %1855 = vmatprep.mubr.f32.mxu0 %v461_v29 }
 0x18d   : > { %1911 = vmatprep.mubr.f32.mxu1 %v463_v31  ;;  %2189 = vmatpush3.bf16.msra.mxu0 %v2789_v56  ;;  %v622_v40 = vpop.f32.mrb[12].mxu1 }
 0x18e   : > { %2221 = vmatpush3.bf16.msra.mxu1 %v2789_v56  ;;  %2191 = vmatprep.subr.bf16.mxu0 %v2800_v60  ;;  %v624_v42 = vpop.f32.mrb[13].mxu1 }
 0x18f   : > { %v467_v33 = vpop.f32.mrb[14].mxu0  ;;  %2223 = vmatprep.subr.bf16.mxu1 %v2800_v60 }
 0x190   : > { %v469_v35 = vpop.f32.mrb[15].mxu0  ;;  %1856 = vmatmul.mubr.f32.gmra.mrb[38].mxu0 %v467_v33 }
 0x191   : > { %1912 = vmatmul.mubr.f32.gmra.mrb[38].mxu1 %v469_v35  ;;  %2193 = vmatpush3.bf16.msra.mxu0 %v2800_v60  ;;  %v628_v44 = vpop.f32.mrb[14].mxu1 }
 0x192   : > { %2225 = vmatpush3.bf16.msra.mxu1 %v2800_v60  ;;  %2195 = vmatprep.subr.bf16.mxu0 %v2849_v10  ;;  %v630_v46 = vpop.f32.mrb[15].mxu1 }
 0x193   : > { %v473_v37 = vpop.f32.mrb[16].mxu0  ;;  %2227 = vmatprep.subr.bf16.mxu1 %v2849_v10 }
 0x194   : > { %v475_v39 = vpop.f32.mrb[17].mxu0  ;;  %1858 = vmatprep.mubr.f32.mxu0 %v473_v37 }
 0x195   : > { %1914 = vmatprep.mubr.f32.mxu1 %v475_v39  ;;  %2197 = vmatpush3.bf16.msra.mxu0 %v2849_v10  ;;  %v634_v48 = vpop.f32.mrb[16].mxu1 }
 0x196   : > { %2229 = vmatpush3.bf16.msra.mxu1 %v2849_v10  ;;  %v636_v50 = vpop.f32.mrb[17].mxu1 }
 0x197   : > { %v479_v41 = vpop.f32.mrb[18].mxu0 }
 0x198   : > { %v481_v43 = vpop.f32.mrb[19].mxu0  ;;  %1859 = vmatmul.mubr.f32.gmra.mrb[40].mxu0 %v479_v41 }
 0x199   : > { %1915 = vmatmul.mubr.f32.gmra.mrb[40].mxu1 %v481_v43  ;;  %v640_v52 = vpop.f32.mrb[18].mxu1 }
 0x19a   : > { %v642_v54 = vpop.f32.mrb[19].mxu1 }
 0x19b   : > { %v485_v45 = vpop.f32.mrb[20].mxu0 }
 0x19c   : > { %v487_v47 = vpop.f32.mrb[21].mxu0  ;;  %1861 = vmatprep.mubr.f32.mxu0 %v485_v45 }
 0x19d   : > { %1917 = vmatprep.mubr.f32.mxu1 %v487_v47  ;;  %v646_v56 = vpop.f32.mrb[20].mxu1 }
 0x19e   : > { %v648_v58 = vpop.f32.mrb[21].mxu1 }
 0x19f   : > { %v491_v49 = vpop.f32.mrb[22].mxu0 }
 0x1a0   : > { %v493_v51 = vpop.f32.mrb[23].mxu0  ;;  %1862 = vmatmul.mubr.f32.gmra.mrb[42].mxu0 %v491_v49 }
 0x1a1   : > { %1918 = vmatmul.mubr.f32.gmra.mrb[42].mxu1 %v493_v51  ;;  %v652_v60 = vpop.f32.mrb[22].mxu1 }
 0x1a2   : > { %v654_v62 = vpop.f32.mrb[23].mxu1 }
 0x1a3   : > { %v497_v53 = vpop.f32.mrb[24].mxu0 }
 0x1a4   : > { %v499_v55 = vpop.f32.mrb[25].mxu0  ;;  %1864 = vmatprep.mubr.f32.mxu0 %v497_v53 }
 0x1a5   : > { %1920 = vmatprep.mubr.f32.mxu1 %v499_v55  ;;  %v658_v1 = vpop.f32.mrb[24].mxu1 }
 0x1a6   : > { %v660_v3 = vpop.f32.mrb[25].mxu1 }
 0x1a7   : > { %v503_v57 = vpop.f32.mrb[26].mxu0 }
 0x1a8   : > { %v505_v59 = vpop.f32.mrb[27].mxu0  ;;  %1865 = vmatmul.mubr.f32.gmra.mrb[44].mxu0 %v503_v57 }
 0x1a9   : > { %1921 = vmatmul.mubr.f32.gmra.mrb[44].mxu1 %v505_v59  ;;  %v664_v5 = vpop.f32.mrb[26].mxu1 }
 0x1aa   : > { %v666_v6 = vpop.f32.mrb[27].mxu1 }
 0x1ab   : > { %v509_v61 = vpop.f32.mrb[28].mxu0 }
 0x1ac   : > { %v511_v63 = vpop.f32.mrb[29].mxu0  ;;  %1867 = vmatprep.mubr.f32.mxu0 %v509_v61 }
 0x1ad   : > { %1923 = vmatprep.mubr.f32.mxu1 %v511_v63  ;;  %v670_v7 = vpop.f32.mrb[28].mxu1 }
 0x1ae   : > { %v672_v8 = vpop.f32.mrb[29].mxu1 }
 0x1af   : > { %v515_v2 = vpop.f32.mrb[30].mxu0 }
 0x1b0   : > { %v517_v4 = vpop.f32.mrb[31].mxu0  ;;  %1868 = vmatmul.mubr.f32.gmra.mrb[46].mxu0 %v515_v2 }
 0x1b1   : > { %1924 = vmatmul.mubr.f32.gmra.mrb[46].mxu1 %v517_v4  ;;  %1958 = vmatprep.mubr.f32.mxu0 %v2862_v16  ;;  %v676_v9 = vpop.f32.mrb[30].mxu1 }
 0x1b2   : > { %2014 = vmatprep.mubr.f32.mxu1 %v2866_v18  ;;  %v678_v10 = vpop.f32.mrb[31].mxu1 }
 0x1b4   : > { %1959 = vmatmul.mubr.f32.vlgmr.msra.gmra.mrb[48].mxu0 %v2870_v20 }
 0x1b5   : > { %1961 = vmatprep.mubr.f32.mxu0 %v2878_v24  ;;  %2015 = vmatmul.mubr.f32.vlgmr.msra.gmra.mrb[48].mxu1 %v2874_v22 }
 0x1b6   : > { %2017 = vmatprep.mubr.f32.mxu1 %v2882_v26 }
 0x1b8   : > { %1962 = vmatmul.mubr.f32.gmra.mrb[50].mxu0 %v2886_v28 }
 0x1b9   : > { %1964 = vmatprep.mubr.f32.mxu0 %v2894_v32  ;;  %2018 = vmatmul.mubr.f32.gmra.mrb[50].mxu1 %v2890_v30 }
 0x1ba   : > { %2020 = vmatprep.mubr.f32.mxu1 %v2898_v34 }
 0x1bc   : > { %1965 = vmatmul.mubr.f32.gmra.mrb[52].mxu0 %v2902_v36 }
 0x1bd   : > { %1967 = vmatprep.mubr.f32.mxu0 %v622_v40  ;;  %2021 = vmatmul.mubr.f32.gmra.mrb[52].mxu1 %v2906_v38 }
 0x1be   : > { %2023 = vmatprep.mubr.f32.mxu1 %v624_v42 }
 0x1c0   : > { %1968 = vmatmul.mubr.f32.gmra.mrb[54].mxu0 %v628_v44 }
 0x1c1   : > { %1970 = vmatprep.mubr.f32.mxu0 %v634_v48  ;;  %2024 = vmatmul.mubr.f32.gmra.mrb[54].mxu1 %v630_v46 }
 0x1c2   : > { %2026 = vmatprep.mubr.f32.mxu1 %v636_v50 }
 0x1c4   : > { %1971 = vmatmul.mubr.f32.gmra.mrb[56].mxu0 %v640_v52 }
 0x1c5   : > { %1973 = vmatprep.mubr.f32.mxu0 %v646_v56  ;;  %2027 = vmatmul.mubr.f32.gmra.mrb[56].mxu1 %v642_v54 }
 0x1c6   : > { %2029 = vmatprep.mubr.f32.mxu1 %v648_v58 }
 0x1c8   : > { %1974 = vmatmul.mubr.f32.gmra.mrb[58].mxu0 %v652_v60 }
 0x1c9   : > { %1976 = vmatprep.mubr.f32.mxu0 %v658_v1  ;;  %2030 = vmatmul.mubr.f32.gmra.mrb[58].mxu1 %v654_v62 }
 0x1ca   : > { %2032 = vmatprep.mubr.f32.mxu1 %v660_v3 }
 0x1cc   : > { %1977 = vmatmul.mubr.f32.gmra.mrb[60].mxu0 %v664_v5 }
 0x1cd   : > { %1979 = vmatprep.mubr.f32.mxu0 %v670_v7  ;;  %2033 = vmatmul.mubr.f32.gmra.mrb[60].mxu1 %v666_v6 }
 0x1ce   : > { %2035 = vmatprep.mubr.f32.mxu1 %v672_v8 }
 0x1d0   : > { %1980 = vmatmul.mubr.f32.gmra.mrb[62].mxu0 %v676_v9 }
 0x1d1   : > { %2036 = vmatmul.mubr.f32.gmra.mrb[62].mxu1 %v678_v10 }
 0x24b   : > { %v1848_v11 = vpop.f32.mrb[32].mxu0 }
 0x24c   : > { %923 = vst [vmem:[%s2924_s20 + $0x8] sm:$0xff] %v1848_v11  ;;  %v843_v12 = vpop.f32.mrb[33].mxu0  ;;  %v1904_v0 = vpop.f32.mrb[32].mxu1 }
 0x24d   : > { %922 = vst [vmem:[%s2924_s20] sm:$0xff] %v843_v12  ;;  %1631 = vst [vmem:[%s2924_s20 + $0x88] sm:$0xff] %v1904_v0  ;;  %v1020_v13 = vpop.f32.mrb[33].mxu1 }
 0x24e   : > { %1630 = vst [vmem:[%s2924_s20 + $0x80] sm:$0xff] %v1020_v13 }
 0x253   : > { %v1851_v14 = vpop.f32.mrb[34].mxu0 }
 0x254   : > { %925 = vst [vmem:[%s2924_s20 + $0x18] sm:$0xff] %v1851_v14  ;;  %v853_v15 = vpop.f32.mrb[35].mxu0  ;;  %v1907_v16 = vpop.f32.mrb[34].mxu1 }
 0x255   : > { %924 = vst [vmem:[%s2924_s20 + $0x10] sm:$0xff] %v853_v15  ;;  %1633 = vst [vmem:[%s2924_s20 + $0x98] sm:$0xff] %v1907_v16  ;;  %v1030_v17 = vpop.f32.mrb[35].mxu1 }
 0x256   : > { %1632 = vst [vmem:[%s2924_s20 + $0x90] sm:$0xff] %v1030_v17 }
 0x25b   : > { %v1854_v18 = vpop.f32.mrb[36].mxu0 }
 0x25c   : > { %927 = vst [vmem:[%s2924_s20 + $0x28] sm:$0xff] %v1854_v18  ;;  %v863_v19 = vpop.f32.mrb[37].mxu0  ;;  %v1910_v20 = vpop.f32.mrb[36].mxu1 }
 0x25d   : > { %926 = vst [vmem:[%s2924_s20 + $0x20] sm:$0xff] %v863_v19  ;;  %1635 = vst [vmem:[%s2924_s20 + $0xa8] sm:$0xff] %v1910_v20  ;;  %v1040_v21 = vpop.f32.mrb[37].mxu1 }
 0x25e   : > { %1634 = vst [vmem:[%s2924_s20 + $0xa0] sm:$0xff] %v1040_v21 }
 0x263   : > { %v1857_v22 = vpop.f32.mrb[38].mxu0 }
 0x264   : > { %929 = vst [vmem:[%s2924_s20 + $0x38] sm:$0xff] %v1857_v22  ;;  %v873_v23 = vpop.f32.mrb[39].mxu0  ;;  %v1913_v24 = vpop.f32.mrb[38].mxu1 }
 0x265   : > { %928 = vst [vmem:[%s2924_s20 + $0x30] sm:$0xff] %v873_v23  ;;  %1637 = vst [vmem:[%s2924_s20 + $0xb8] sm:$0xff] %v1913_v24  ;;  %v1050_v25 = vpop.f32.mrb[39].mxu1 }
 0x266   : > { %1636 = vst [vmem:[%s2924_s20 + $0xb0] sm:$0xff] %v1050_v25 }
 0x26b   : > { %v1860_v26 = vpop.f32.mrb[40].mxu0 }
 0x26c   : > { %931 = vst [vmem:[%s2924_s20 + $0x48] sm:$0xff] %v1860_v26  ;;  %v883_v27 = vpop.f32.mrb[41].mxu0  ;;  %v1916_v28 = vpop.f32.mrb[40].mxu1 }
 0x26d   : > { %930 = vst [vmem:[%s2924_s20 + $0x40] sm:$0xff] %v883_v27  ;;  %1639 = vst [vmem:[%s2924_s20 + $0xc8] sm:$0xff] %v1916_v28  ;;  %v1060_v29 = vpop.f32.mrb[41].mxu1 }
 0x26e   : > { %1638 = vst [vmem:[%s2924_s20 + $0xc0] sm:$0xff] %v1060_v29 }
 0x273   : > { %v1863_v30 = vpop.f32.mrb[42].mxu0 }
 0x274   : > { %933 = vst [vmem:[%s2924_s20 + $0x58] sm:$0xff] %v1863_v30  ;;  %v893_v31 = vpop.f32.mrb[43].mxu0  ;;  %v1919_v32 = vpop.f32.mrb[42].mxu1 }
 0x275   : > { %932 = vst [vmem:[%s2924_s20 + $0x50] sm:$0xff] %v893_v31  ;;  %1641 = vst [vmem:[%s2924_s20 + $0xd8] sm:$0xff] %v1919_v32  ;;  %v1070_v33 = vpop.f32.mrb[43].mxu1 }
 0x276   : > { %1640 = vst [vmem:[%s2924_s20 + $0xd0] sm:$0xff] %v1070_v33 }
 0x27b   : > { %v1866_v34 = vpop.f32.mrb[44].mxu0 }
 0x27c   : > { %935 = vst [vmem:[%s2924_s20 + $0x68] sm:$0xff] %v1866_v34  ;;  %v903_v35 = vpop.f32.mrb[45].mxu0  ;;  %v1922_v36 = vpop.f32.mrb[44].mxu1 }
 0x27d   : > { %934 = vst [vmem:[%s2924_s20 + $0x60] sm:$0xff] %v903_v35  ;;  %1643 = vst [vmem:[%s2924_s20 + $0xe8] sm:$0xff] %v1922_v36  ;;  %v1080_v37 = vpop.f32.mrb[45].mxu1 }
 0x27e   : > { %1642 = vst [vmem:[%s2924_s20 + $0xe0] sm:$0xff] %v1080_v37 }
 0x283   : > { %v1869_v38 = vpop.f32.mrb[46].mxu0 }
 0x284   : > { %937 = vst [vmem:[%s2924_s20 + $0x78] sm:$0xff] %v1869_v38  ;;  %v913_v39 = vpop.f32.mrb[47].mxu0  ;;  %v1925_v40 = vpop.f32.mrb[46].mxu1 }
 0x285   : > { %936 = vst [vmem:[%s2924_s20 + $0x70] sm:$0xff] %v913_v39  ;;  %1645 = vst [vmem:[%s2924_s20 + $0xf8] sm:$0xff] %v1925_v40  ;;  %v1090_v41 = vpop.f32.mrb[47].mxu1 }
 0x286   : > { %1644 = vst [vmem:[%s2924_s20 + $0xf0] sm:$0xff] %v1090_v41 }
 0x287   : > { %v1960_v42 = vpop.f32.mrb[48].mxu0 }
 0x288   : > { %1647 = vst [vmem:[%s2924_s20 + $0x108] sm:$0xff] %v1960_v42  ;;  %v1198_v43 = vpop.f32.mrb[49].mxu0  ;;  %v2016_v44 = vpop.f32.mrb[48].mxu1 }
 0x289   : > { %1646 = vst [vmem:[%s2924_s20 + $0x100] sm:$0xff] %v1198_v43  ;;  %1663 = vst [vmem:[%s2924_s20 + $0x188] sm:$0xff] %v2016_v44  ;;  %v1376_v45 = vpop.f32.mrb[49].mxu1 }
 0x28a   : > { %1662 = vst [vmem:[%s2924_s20 + $0x180] sm:$0xff] %v1376_v45 }
 0x28b   : > { %v1963_v46 = vpop.f32.mrb[50].mxu0 }
 0x28c   : > { %1649 = vst [vmem:[%s2924_s20 + $0x118] sm:$0xff] %v1963_v46  ;;  %v1208_v47 = vpop.f32.mrb[51].mxu0  ;;  %v2019_v48 = vpop.f32.mrb[50].mxu1 }
 0x28d   : > { %1648 = vst [vmem:[%s2924_s20 + $0x110] sm:$0xff] %v1208_v47  ;;  %1665 = vst [vmem:[%s2924_s20 + $0x198] sm:$0xff] %v2019_v48  ;;  %v1386_v49 = vpop.f32.mrb[51].mxu1 }
 0x28e   : > { %1664 = vst [vmem:[%s2924_s20 + $0x190] sm:$0xff] %v1386_v49 }
 0x28f   : > { %v1966_v50 = vpop.f32.mrb[52].mxu0 }
 0x290   : > { %1651 = vst [vmem:[%s2924_s20 + $0x128] sm:$0xff] %v1966_v50  ;;  %v1218_v51 = vpop.f32.mrb[53].mxu0  ;;  %v2022_v52 = vpop.f32.mrb[52].mxu1 }
 0x291   : > { %1650 = vst [vmem:[%s2924_s20 + $0x120] sm:$0xff] %v1218_v51  ;;  %1667 = vst [vmem:[%s2924_s20 + $0x1a8] sm:$0xff] %v2022_v52  ;;  %v1396_v53 = vpop.f32.mrb[53].mxu1 }
 0x292   : > { %1666 = vst [vmem:[%s2924_s20 + $0x1a0] sm:$0xff] %v1396_v53 }
 0x293   : > { %v1969_v54 = vpop.f32.mrb[54].mxu0 }
 0x294   : > { %1653 = vst [vmem:[%s2924_s20 + $0x138] sm:$0xff] %v1969_v54  ;;  %v1228_v55 = vpop.f32.mrb[55].mxu0  ;;  %v2025_v56 = vpop.f32.mrb[54].mxu1 }
 0x295   : > { %1652 = vst [vmem:[%s2924_s20 + $0x130] sm:$0xff] %v1228_v55  ;;  %1669 = vst [vmem:[%s2924_s20 + $0x1b8] sm:$0xff] %v2025_v56  ;;  %v1406_v57 = vpop.f32.mrb[55].mxu1 }
 0x296   : > { %1668 = vst [vmem:[%s2924_s20 + $0x1b0] sm:$0xff] %v1406_v57 }
 0x297   : > { %v1972_v58 = vpop.f32.mrb[56].mxu0 }
 0x298   : > { %1655 = vst [vmem:[%s2924_s20 + $0x148] sm:$0xff] %v1972_v58  ;;  %v1238_v59 = vpop.f32.mrb[57].mxu0  ;;  %v2028_v60 = vpop.f32.mrb[56].mxu1 }
 0x299   : > { %1654 = vst [vmem:[%s2924_s20 + $0x140] sm:$0xff] %v1238_v59  ;;  %1671 = vst [vmem:[%s2924_s20 + $0x1c8] sm:$0xff] %v2028_v60  ;;  %v1416_v61 = vpop.f32.mrb[57].mxu1 }
 0x29a   : > { %1670 = vst [vmem:[%s2924_s20 + $0x1c0] sm:$0xff] %v1416_v61 }
 0x29b   : > { %v1975_v62 = vpop.f32.mrb[58].mxu0 }
 0x29c   : > { %1657 = vst [vmem:[%s2924_s20 + $0x158] sm:$0xff] %v1975_v62  ;;  %v1248_v63 = vpop.f32.mrb[59].mxu0  ;;  %v2031_v1 = vpop.f32.mrb[58].mxu1 }
 0x29d   : > { %1656 = vst [vmem:[%s2924_s20 + $0x150] sm:$0xff] %v1248_v63  ;;  %1673 = vst [vmem:[%s2924_s20 + $0x1d8] sm:$0xff] %v2031_v1  ;;  %v1426_v2 = vpop.f32.mrb[59].mxu1 }
 0x29e   : > { %1672 = vst [vmem:[%s2924_s20 + $0x1d0] sm:$0xff] %v1426_v2 }
 0x29f   : > { %v1978_v3 = vpop.f32.mrb[60].mxu0 }
 0x2a0   : > { %1659 = vst [vmem:[%s2924_s20 + $0x168] sm:$0xff] %v1978_v3  ;;  %v1258_v4 = vpop.f32.mrb[61].mxu0  ;;  %v2034_v5 = vpop.f32.mrb[60].mxu1 }
 0x2a1   : > { %1658 = vst [vmem:[%s2924_s20 + $0x160] sm:$0xff] %v1258_v4  ;;  %1675 = vst [vmem:[%s2924_s20 + $0x1e8] sm:$0xff] %v2034_v5  ;;  %v1436_v6 = vpop.f32.mrb[61].mxu1 }
 0x2a2   : > { %1674 = vst [vmem:[%s2924_s20 + $0x1e0] sm:$0xff] %v1436_v6 }
 0x2a3   : > { %v1981_v7 = vpop.f32.mrb[62].mxu0 }
 0x2a4   : > { %1661 = vst [vmem:[%s2924_s20 + $0x178] sm:$0xff] %v1981_v7  ;;  %v1268_v8 = vpop.f32.mrb[63].mxu0  ;;  %v2037_v9 = vpop.f32.mrb[62].mxu1 }
 0x2a5   : > { %1660 = vst [vmem:[%s2924_s20 + $0x170] sm:$0xff] %v1268_v8  ;;  %1677 = vst [vmem:[%s2924_s20 + $0x1f8] sm:$0xff] %v2037_v9  ;;  %v1446_v10 = vpop.f32.mrb[63].mxu1 }
 0x2a6   : > { %1676 = vst [vmem:[%s2924_s20 + $0x1f0] sm:$0xff] %v1446_v10 }
 0x2a7   : > { %2416 = shalt.err (!%p2413_p8)
}
 0x2a8   : > { %s2417_s27 = scalar_lea.hbm %s2991_s10, 8192  ;;  %s2421_s8 = scalar_lea.hbm %s3049_s3, 16384 }
 0x2a9   : > { %p2418_p12 = scmp.ne.s32.totalorder %s2991_s10, %s2417_s27  ;;  %p2422_p6 = scmp.lt.u32.totalorder %s2991_s10, %s3049_s3 }
 0x2aa   : > { %p2423_p13 = scmp.lt.u32.totalorder %s2421_s8, %s2417_s27  ;;  %p2425_p5 = scmp.lt.u32.totalorder %s2417_s27, %s2991_s10 }
 0x2ab   : > { %p2419_p11 = pnand %p2418_p12, %p2618_p10 }
 0x2ac   : > { %p2424_p0 = por %p2423_p13, %p2422_p6 }
 0x2ad   : > { %p2420_p3 = pneg %p2419_p11 }
 0x2ae   : > { %p2426_p9 = por %p2425_p5, %p2424_p0 }
 0x2b0   : > { %p2427_p1 = pnand %p2426_p9, %p2420_p3 }
 0x2b2   : > { %2430 = shalt.err (!%p2427_p1)
}
 0x2b3   : > { %s2504_s9 = smov 128   ;;  %s2505_s18 = smov 8  }
 0x2b4   : > { %2238 = dma.vmem_to_hbm [thread:$0]  (%p2618_p10), %s2993_s23, 8192, %s2991_s10, %s1473_s15, %s2504_s9, %s2504_s9, %s2505_s18  }
 0x2b5 PF: > { %s1504_s20 = sand.u32 1, %s2473_s12   ;;  %p3069_p2 = scmp.ne.s32.totalorder %s3056_s21, 0 }
 0x2b6   : > { %p3070_p7 = scmp.ge.s32.totalorder %s2493_s17, 2  ;;  %s1505_s11 = scalar_lea.sflag [#allocation5], %s1504_s20 }
 0x2b8   : > { %p2252_p4 = pnand %p3070_p7, %p3069_p2 }
 0x2ba   : > { %2468 = dma.done.wait (!%p2252_p4), %s1505_s11, 8192  }
 0x2bb   : > { %2470 = vsyncadd (!%p2252_p4), %s1505_s11, 4294959104  ;;  %s22_s17 = sadd.s32 1, %s2493_s17   ;;  %s3071_s12 = smov %s2477_s13 }
 0x2bc   : > { %p19_p8 = scmp.ge.s32.totalorder %s22_s17, 4   ;;  %s3072_s13 = smov %s2481_s14 }
 0x2bd   : > { %s3073_s14 = smov %s2629_s29  ;;  %s3074_s15 = smov %s2489_s16 }
 0x2be   : > { %s3075_s16 = smov %s3077_s26  ;;  %21 = sbr.rel (!%p19_p8) target bundleno = 11 (0xb), region = 101 }
 0x2c5   :  { %1510 = vsyncpa [#allocation4], 1 }
 0x2c6   :  { %1512 = vsyncpa [#allocation4 + $0x1], 1 }
 0x2c7   :  { %1513 = vsyncpa [#allocation7], 1 }
 0x2c8   :  { %1515 = vsyncpa [#allocation7 + $0x1], 1 }
 0x2c9   :  { %1516 = vsyncpa [#allocation5], 1 }
 0x2ca   :  { %1518 = vsyncpa [#allocation5 + $0x1], 1 }

// kernel: tpu_custom_call.1
= control target key start
LH: loop header
LB: loop body
LE: loop exit
PB: predicated region body
PF: predicated region fallthrough
CT: control target
= control target key end

     0   :  { %s3046_s0 = inlined_call_operand.hbm [shape: f32[2,128,128], index: 0, kind: input, shape index: {}]   ;;  %s3047_s1 = inlined_call_operand.hbm [shape: f32[2,128,128], index: 1, kind: input, shape index: {}]   ;;  %s3048_s2 = inlined_call_operand.hbm [shape: f32[128,512], index: 2, kind: input, shape index: {}]   ;;  %s3049_s3 = inlined_call_operand.hbm [shape: f32[2,4,128,128], index: 3, kind: output, shape index: {}]  }
   0x1   :  { %3053 = sst [smem:[#allocation14_spill]] %s3046_s0 }
   0x2   :  { %3054 = sst [smem:[#allocation15_spill]] %s3048_s2 }
   0x3   :  { %8 = vsyncpa [#allocation4], 0 }
   0x4   :  { %10 = vsyncpa [#allocation4 + $0x1], 0 }
   0x5   :  { %11 = vsyncpa [#allocation7], 0 }
   0x6   :  { %13 = vsyncpa [#allocation7 + $0x1], 0 }
   0x7   :  { %14 = vsyncpa [#allocation5], 0 }
   0x8   :  { %16 = vsyncpa [#allocation5 + $0x1], 0  ;;  %s2526_s12 = smov 0   ;;  %s2528_s13 = smov 0  }
   0x9   :  { %s2530_s14 = smov 0   ;;  %s2532_s15 = smov 0  }
   0xa   :  { %s2534_s16 = smov 0   ;;  %s2536_s17 = smov 0  }
   0xb LB: > { %s2557_s18 = sadd.s32 4294967295, %s2493_s17   ;;  %s1615_s19 = sadd.s32 4294967294, %s2493_s17   ;;  %s2493_s17 = sphi %s2536_s17, %s22_s17   ;;  %s2489_s16 = sphi %s2534_s16, %s3075_s16   ;;  %s2485_s15 = sphi %s2532_s15, %s3074_s15   ;;  %s2481_s14 = sphi %s2530_s14, %s3073_s14   ;;  %s2477_s13 = sphi %s2528_s13, %s3072_s13   ;;  %s2473_s12 = sphi %s2526_s12, %s3071_s12  }
   0xc   : > { %p63_p0 = scmp.ne.s32.totalorder %s2477_s13, %s2473_s12  ;;  %p3050_p1 = scmp.eq.s32.totalorder %s2557_s18, 0 }
   0xd   : > { %p146_p3 = scmp.eq.s32.totalorder %s1615_s19, 1  ;;  %p1616_p5 = scmp.ge.s32.totalorder %s2493_s17, 1 }
   0xe   : > { %p2566_p4 = por %p3050_p1, %p63_p0  ;;  %p153_p7 = scmp.lt.s32.totalorder %s2493_s17, 3 }
   0xf   : > { %p2571_p6 = por %p146_p3, %p63_p0  ;;  %s2495_s23 = smov [#allocation8]  }
  0x10   : > { %s3055_s20 = scalar_select %p2566_p4, 1, 0 }
  0x11   : > { %s3056_s21 = scalar_select %p2571_p6, 1, 0 }
  0x12   : > { %p2576_p8 = pnand %p1616_p5, %p153_p7  ;;  %s165_s24 = sshll.u32 %s2495_s23, 4  ;;  %s166_s24 = int_to_ptr.vmem [resolvable:$true] %s165_s24 }
  0x13   : > { %s41_s26 = sadd.s32 1, %s2489_s16  ;;  %s3059_s2 = sld [smem:[#allocation15_spill]] }
  0x14   : > { %s3057_s22 = scalar_select %p2576_p8, 1, 0 }
  0x15   : > { %p2240_p9 = pneg %p2576_p8 }
  0x17   : > { %p2585_p11 = pnand %p2240_p9, %p3050_p1 }
  0x19   : > { %s2315_s29 = scalar_lea.hbm %s3059_s2, 8192  ;;  %p2317_p13 = pneg %p2585_p11 }
  0x1a   : > { %p2316_p12 = scmp.ne.s32.totalorder %s3059_s2, %s2315_s29  ;;  %p2322_p5 = scmp.lt.u32.totalorder %s2315_s29, %s3059_s2 }
  0x1c   : > { %p2318_p0 = pnand %p2317_p13, %p2316_p12 }
  0x1e   : > { %p2319_p3 = pneg %p2318_p0 }
  0x20   : > { %p2324_p7 = pnand %p2322_p5, %p2319_p3 }
  0x22   : > { %2327 = shalt.err (!%p2324_p7)
}
  0x23   : > { %s2328_s7 = scalar_lea.vmem %s166_s24, 8192  ;;  %p2336_p2 = scmp.lt.s32.totalorder %s166_s24, %s166_s24 }
  0x24   : > { %p2329_p9 = scmp.ne.s32.totalorder %s166_s24, %s2328_s7  ;;  %p2337_p6 = scmp.lt.s32.totalorder %s2328_s7, %s2328_s7 }
  0x26   : > { %p2331_p10 = pnand %p2329_p9, %p2317_p13  ;;  %p2338_p4 = por %p2337_p6, %p2336_p2 }
  0x28   : > { %p2332_p1 = pneg %p2331_p10 }
  0x2a   : > { %p2339_p8 = pnand %p2338_p4, %p2332_p1 }
  0x2c   : > { %2342 = shalt.err (!%p2339_p8)
}
  0x2d   : > { %s2496_s8 = smov 512   ;;  %s2497_s9 = smov 32  }
  0x2e   : > { %2243 = dma.hbm_to_vmem [thread:$0]  (!%p2585_p11), %s3059_s2, 8192, %s166_s24, [#allocation7], %s2496_s8, %s2496_s8, %s2497_s9  }
  0x2f   : > { %p43_p1 = scmp.ge.s32.totalorder %s41_s26, 2  ;;  %s50_s19 = sadd.s32 1, %s2481_s14 }
  0x30   : > { %p57_p2 = scmp.ne.s32.totalorder %s2481_s14, %s2477_s13  ;;  %p58_p4 = scmp.eq.s32.totalorder %s2493_s17, 0 }
  0x31   : > { %s3077_s26 = smov (%p43_p1, %s41_s26), 0  ;;  %p3061_p8 = scmp.eq.s32.totalorder %s2557_s18, 1 }
  0x32   : > { %p2612_p6 = por %p58_p4, %p57_p2  ;;  %s45_s27 = ssub.s32 %s2489_s16, %s3077_s26 }
  0x33   : > { %p2618_p10 = por %p3061_p8, %p57_p2  ;;  %p2256_p12 = scmp.lt.s32.totalorder %s2493_s17, 2 }
  0x34   : > { %p48_p11 = scmp.eq.s32.totalorder %s45_s27, 0  ;;  %s179_s24 = sand.u32 1, %s2481_s14  }
  0x35   : > { %s2626_s28 = sshll.u32 %s179_s24, 7  ;;  %s1683_s30 = sshll.u32 %s2489_s16, 11 }
  0x36   : > { %s2629_s29 = scalar_select %p48_p11, %s2481_s14, %s50_s19  }
  0x37   : > { %s3063_s0 = sld [smem:[#allocation14_spill]]  ;;  %s183_s7 = scalar_lea.vmem [#allocation3], %s2626_s28 }
  0x38   : > { %s192_s8 = sshll.u32 %s183_s7, 4  ;;  %p2644_p13 = pnand %p2256_p12, %p2612_p6  ;;  %s2640_s8 = int_to_ptr.vmem [resolvable:$true] %s192_s8 }
  0x39   : > { %s2648_s10 = scalar_lea.sflag [#allocation4], %s179_s24 }
  0x3a   : > { %p2345_p3 = pneg %p2644_p13 }
  0x3d   : > { %s2637_s6 = scalar_lea.hbm %s3063_s0, %s1683_s30  ;;  %s2348_s23 = scalar_lea.hbm %s3063_s0, 4096 }
  0x3e   : > { %s2343_s11 = scalar_lea.hbm %s2637_s6, 2048  ;;  %p2349_p9 = scmp.lt.u32.totalorder %s2637_s6, %s3063_s0 }
  0x3f   : > { %p2344_p0 = scmp.ne.s32.totalorder %s2637_s6, %s2343_s11  ;;  %p2350_p1 = scmp.lt.u32.totalorder %s2348_s23, %s2343_s11 }
  0x40   : > { %p2352_p4 = scmp.lt.u32.totalorder %s2343_s11, %s2637_s6 }
  0x41   : > { %p2346_p5 = pnand %p2345_p3, %p2344_p0  ;;  %p2351_p2 = por %p2350_p1, %p2349_p9 }
  0x43   : > { %p2347_p7 = pneg %p2346_p5  ;;  %p2353_p6 = por %p2352_p4, %p2351_p2 }
  0x45   : > { %p2354_p8 = pnand %p2353_p6, %p2347_p7 }
  0x47   : > { %2357 = shalt.err (!%p2354_p8)
}
  0x48   : > { %s2358_s24 = scalar_lea.vmem %s2640_s8, 2048  ;;  %s2498_s7 = smov [#allocation3]  }
  0x49   : > { %p2359_p12 = scmp.ne.s32.totalorder %s2640_s8, %s2358_s24  ;;  %s2363_s19 = sshll.u32 %s2498_s7, 4  ;;  %s2364_s19 = int_to_ptr.vmem [resolvable:$false] %s2363_s19 }
  0x4a   : > { %s2365_s27 = scalar_lea.vmem %s2364_s19, 4096  ;;  %p2366_p5 = scmp.lt.s32.totalorder %s2640_s8, %s2364_s19 }
  0x4b   : > { %p2361_p11 = pnand %p2359_p12, %p2345_p3  ;;  %p2367_p9 = scmp.lt.s32.totalorder %s2365_s27, %s2358_s24 }
  0x4d   : > { %p2362_p0 = pneg %p2361_p11  ;;  %p2368_p1 = por %p2367_p9, %p2366_p5 }
  0x4f   : > { %p2369_p2 = pnand %p2368_p1, %p2362_p0 }
  0x51   : > { %2372 = shalt.err (!%p2369_p2)
}
  0x52   : > { %s2499_s11 = smov 128   ;;  %s2500_s23 = smov 8  }
  0x53   : > { %2247 = dma.hbm_to_vmem [thread:$0]  (!%p2644_p13), %s2637_s6, 2048, %s2640_s8, %s2648_s10, %s2499_s11, %s2499_s11, %s2500_s23  }
  0x54   : > { %s2684_s24 = scalar_lea.hbm %s3047_s1, %s1683_s30  ;;  %s206_s7 = scalar_lea.vmem [#allocation6], %s2626_s28 }
  0x55   : > { %s214_s19 = sshll.u32 %s206_s7, 4  ;;  %s202_s27 = sand.u32 1, %s2493_s17   ;;  %s2687_s19 = int_to_ptr.vmem [resolvable:$true] %s214_s19 }
  0x56   : > { %s2690_s0 = scalar_lea.sflag [#allocation7], %s202_s27  ;;  %s2373_s2 = scalar_lea.hbm %s2684_s24, 2048 }
  0x57   : > { %p2374_p7 = scmp.ne.s32.totalorder %s2684_s24, %s2373_s2  ;;  %s2378_s8 = scalar_lea.hbm %s3047_s1, 4096 }
  0x58   : > { %p2379_p8 = scmp.lt.u32.totalorder %s2684_s24, %s3047_s1  ;;  %p2380_p12 = scmp.lt.u32.totalorder %s2378_s8, %s2373_s2 }
  0x59   : > { %p2376_p4 = pnand %p2374_p7, %p2345_p3  ;;  %p2382_p0 = scmp.lt.u32.totalorder %s2373_s2, %s2684_s24 }
  0x5a   : > { %p2381_p11 = por %p2380_p12, %p2379_p8 }
  0x5b   : > { %p2377_p6 = pneg %p2376_p4 }
  0x5c   : > { %p2383_p5 = por %p2382_p0, %p2381_p11 }
  0x5e   : > { %p2384_p9 = pnand %p2383_p5, %p2377_p6 }
  0x60   : > { %2387 = shalt.err (!%p2384_p9)
}
  0x61   : > { %s2388_s28 = scalar_lea.vmem %s2687_s19, 2048  ;;  %s2501_s5 = smov [#allocation6]  }
  0x62   : > { %p2389_p1 = scmp.ne.s32.totalorder %s2687_s19, %s2388_s28  ;;  %s2393_s7 = sshll.u32 %s2501_s5, 4  ;;  %s2394_s7 = int_to_ptr.vmem [resolvable:$false] %s2393_s7 }
  0x63   : > { %s2395_s27 = scalar_lea.vmem %s2394_s7, 4096  ;;  %p2396_p4 = scmp.lt.s32.totalorder %s2687_s19, %s2394_s7 }
  0x64   : > { %p2391_p2 = pnand %p2389_p1, %p2345_p3  ;;  %p2397_p8 = scmp.lt.s32.totalorder %s2395_s27, %s2388_s28 }
  0x66   : > { %p2392_p7 = pneg %p2391_p2  ;;  %p2398_p12 = por %p2397_p8, %p2396_p4 }
  0x68   : > { %p2399_p11 = pnand %p2398_p12, %p2392_p7 }
  0x6a   : > { %2402 = shalt.err (!%p2399_p11)
}
  0x6b   : > { %2250 = dma.hbm_to_vmem [thread:$0]  (!%p2644_p13), %s2684_s24, 2048, %s2687_s19, %s2690_s0, %s2499_s11, %s2499_s11, %s2500_s23  }
  0x6c   : > { %p3065_p3 = scmp.ne.s32.totalorder %s3057_s22, 0 }
  0x6d   : > { %s2722_s2 = sand.u32 (!%p3065_p3), 1, %s2477_s13   ;;  %p3066_p6 = scmp.ne.s32.totalorder (!%p3065_p3), %s3055_s20, 0 }
  0x6e   : > { %226 = sbr.rel (%p3065_p3) target bundleno = 693 (0x2b5), region = 32  ;;  %s1626_s6 = sshll.u32 (!%p3065_p3), %s2722_s2, 7 }
  0x6f   : > { %s229_s30 = scalar_lea.sflag (!%p3065_p3), [#allocation4], %s2722_s2  ;;  %s2726_s8 = scalar_lea.vmem (!%p3065_p3), [#allocation3], %s1626_s6 }
  0x75   : > { %2456 = dma.done.wait (%p3066_p6), %s229_s30, 2048  }
  0x76   : > { %2458 = vsyncadd (%p3066_p6), %s229_s30, 4294965248  ;;  %s237_s0 = sand.u32 1, %s2557_s18   ;;  %s2733_s9 = scalar_lea.vmem [#allocation6], %s1626_s6 }
  0x77   : > { %s238_s22 = scalar_lea.sflag [#allocation7], %s237_s0 }
  0x78   : > { %2460 = dma.done.wait (%p3066_p6), %s238_s22, 2048  }
  0x79   : > { %2462 = vsyncadd (%p3066_p6), %s238_s22, 4294965248  ;;  %p3067_p13 = scmp.eq.s32.totalorder %s2557_s18, 0 }
  0x7b   : > { %2464 = dma.done.wait (%p3067_p13), [#allocation7], 8192   ;;  %p3068_p0 = pmov %p3067_p13 }
  0x7c   : > { %v2502_v0 = vmov 0.0   ;;  %v296_v1 = vld [vmem:[#allocation8 + $0x8] sm:$0xff]  ;;  %v295_v3 = vld [vmem:[#allocation8] sm:$0xff]  ;;  %v298_v26 = vld [vmem:[#allocation8 + $0x18] sm:$0xff]  ;;  %s1629_s18 = sshll.u32 %s2722_s2, 9  ;;  %s1685_s11 = sshll.u32 %s2485_s15, 13 }
  0x7d   : > { %2466 = vsyncadd (%p3068_p0), [#allocation7], 4294959104  ;;  %423 = vmatprep.mubr.f32.mxu0 %v2502_v0  ;;  %584 = vmatprep.mubr.f32.mxu1 %v2502_v0  ;;  %v300_v2 = vld [vmem:[#allocation8 + $0x28] sm:$0xff]  ;;  %v299_v5 = vld [vmem:[#allocation8 + $0x20] sm:$0xff]  ;;  %s2924_s20 = scalar_lea.vmem [#allocation9], %s1629_s18  ;;  %s2991_s10 = scalar_lea.hbm %s3049_s3, %s1685_s11 }
  0x7e   : > { %v2038_v4 = vpack.c.bf16 %v300_v2, %v296_v1  ;;  %v304_v6 = vld [vmem:[#allocation8 + $0x48] sm:$0xff]  ;;  %v2040_v8 = vpack.c.bf16 %v299_v5, %v295_v3  ;;  %v303_v10 = vld [vmem:[#allocation8 + $0x40] sm:$0xff]  ;;  %v302_v29 = vld [vmem:[#allocation8 + $0x38] sm:$0xff]  ;;  %s1489_s23 = sshll.u32 %s2924_s20, 4  ;;  %s1473_s15 = scalar_lea.sflag [#allocation5], %s2722_s2  ;;  %s2993_s23 = int_to_ptr.vmem [resolvable:$true] %s1489_s23 }
  0x7f   : > { %v308_v7 = vld [vmem:[#allocation8 + $0x68] sm:$0xff]  ;;  %v307_v11 = vld [vmem:[#allocation8 + $0x60] sm:$0xff]  ;;  %v297_v30 = vld [vmem:[#allocation8 + $0x10] sm:$0xff]  ;;  %v2070_v32 = vpack.c.bf16 %v302_v29, %v298_v26  ;;  %s2403_s4 = scalar_lea.vmem %s2993_s23, 8192  ;;  %s2503_s28 = smov [#allocation9]  }
  0x80   : > { %v2042_v9 = vpack.c.bf16 %v308_v7, %v304_v6  ;;  %v312_v12 = vld [vmem:[#allocation8 + $0x88] sm:$0xff]  ;;  %2039 = vmatprep.subr.bf16.mxu0 %v2038_v4  ;;  %v2044_v14 = vpack.c.bf16 %v307_v11, %v303_v10  ;;  %v311_v16 = vld [vmem:[#allocation8 + $0x80] sm:$0xff]  ;;  %v301_v33 = vld [vmem:[#allocation8 + $0x30] sm:$0xff]  ;;  %p2404_p5 = scmp.ne.s32.totalorder %s2993_s23, %s2403_s4  ;;  %s2407_s5 = sshll.u32 %s2503_s28, 4  ;;  %s2408_s5 = int_to_ptr.vmem [resolvable:$false] %s2407_s5 }
  0x81   : > { %v316_v13 = vld [vmem:[#allocation8 + $0xa8] sm:$0xff]  ;;  %2041 = vmatpush1.bf16.msra.mxu0 %v2040_v8  ;;  %v315_v17 = vld [vmem:[#allocation8 + $0xa0] sm:$0xff]  ;;  %v306_v34 = vld [vmem:[#allocation8 + $0x58] sm:$0xff]  ;;  %v2072_v38 = vpack.c.bf16 %v301_v33, %v297_v30  ;;  %2071 = vmatprep.subr.bf16.mxu1 %v2070_v32  ;;  %s2409_s7 = scalar_lea.vmem %s2408_s5, 16384  ;;  %p2410_p2 = scmp.lt.s32.totalorder %s2993_s23, %s2408_s5 }
  0x82   : > { %2043 = vmatprep.subr.bf16.mxu0 %v2042_v9  ;;  %v2046_v15 = vpack.c.bf16 %v316_v13, %v312_v12  ;;  %v320_v18 = vld [vmem:[#allocation8 + $0xc8] sm:$0xff]  ;;  %v2048_v20 = vpack.c.bf16 %v315_v17, %v311_v16  ;;  %v319_v22 = vld [vmem:[#allocation8 + $0xc0] sm:$0xff]  ;;  %v310_v35 = vld [vmem:[#allocation8 + $0x78] sm:$0xff]  ;;  %p2405_p9 = pnand %p2404_p5, %p2618_p10  ;;  %p2411_p7 = scmp.lt.s32.totalorder %s2409_s7, %s2403_s4 }
  0x83   : > { %v324_v19 = vld [vmem:[#allocation8 + $0xe8] sm:$0xff]  ;;  %v323_v23 = vld [vmem:[#allocation8 + $0xe0] sm:$0xff]  ;;  %v2074_v39 = vpack.c.bf16 %v310_v35, %v306_v34  ;;  %v305_v40 = vld [vmem:[#allocation8 + $0x50] sm:$0xff]  ;;  %2073 = vmatpush1.bf16.msra.mxu1 %v2072_v38 }
  0x84   : > { %v2050_v21 = vpack.c.bf16 %v324_v19, %v320_v18  ;;  %v328_v24 = vld [vmem:[#allocation8 + $0x108] sm:$0xff]  ;;  %v327_v27 = vld [vmem:[#allocation8 + $0x100] sm:$0xff]  ;;  %v2052_v31 = vpack.c.bf16 %v323_v23, %v319_v22  ;;  %v309_v41 = vld [vmem:[#allocation8 + $0x70] sm:$0xff]  ;;  %p2406_p1 = pneg %p2405_p9  ;;  %p2412_p4 = por %p2411_p7, %p2410_p2 }
  0x85   : > { %2045 = vmatpush1.bf16.msra.mxu0 %v2044_v14  ;;  %v332_v25 = vld [vmem:[#allocation8 + $0x128] sm:$0xff]  ;;  %v331_v28 = vld [vmem:[#allocation8 + $0x120] sm:$0xff]  ;;  %v314_v43 = vld [vmem:[#allocation8 + $0x98] sm:$0xff]  ;;  %v2076_v45 = vpack.c.bf16 %v309_v41, %v305_v40  ;;  %2075 = vmatprep.subr.bf16.mxu1 %v2074_v39 }
  0x86   : > { %2047 = vmatprep.subr.bf16.mxu0 %v2046_v15  ;;  %v2054_v36 = vpack.c.bf16 %v332_v25, %v328_v24  ;;  %v336_v37 = vld [vmem:[#allocation8 + $0x148] sm:$0xff]  ;;  %v318_v44 = vld [vmem:[#allocation8 + $0xb8] sm:$0xff]  ;;  %v2056_v46 = vpack.c.bf16 %v331_v28, %v327_v27  ;;  %v335_v47 = vld [vmem:[#allocation8 + $0x140] sm:$0xff]  ;;  %p2413_p8 = pnand %p2412_p4, %p2406_p1 }
  0x87   : > { %v340_v42 = vld [vmem:[#allocation8 + $0x168] sm:$0xff]  ;;  %v2078_v48 = vpack.c.bf16 %v318_v44, %v314_v43  ;;  %v313_v49 = vld [vmem:[#allocation8 + $0x90] sm:$0xff]  ;;  %v339_v52 = vld [vmem:[#allocation8 + $0x160] sm:$0xff]  ;;  %2077 = vmatpush1.bf16.msra.mxu1 %v2076_v45 }
  0x88   : > { %v317_v50 = vld [vmem:[#allocation8 + $0xb0] sm:$0xff]  ;;  %v2058_v51 = vpack.c.bf16 %v340_v42, %v336_v37  ;;  %v322_v53 = vld [vmem:[#allocation8 + $0xd8] sm:$0xff]  ;;  %v344_v55 = vld [vmem:[#allocation8 + $0x188] sm:$0xff]  ;;  %v2060_v58 = vpack.c.bf16 %v339_v52, %v335_v47 }
  0x89   : > { %2049 = vmatpush1.bf16.msra.mxu0 %v2048_v20  ;;  %v326_v54 = vld [vmem:[#allocation8 + $0xf8] sm:$0xff]  ;;  %v348_v56 = vld [vmem:[#allocation8 + $0x1a8] sm:$0xff]  ;;  %v2080_v57 = vpack.c.bf16 %v317_v50, %v313_v49  ;;  %v343_v59 = vld [vmem:[#allocation8 + $0x180] sm:$0xff]  ;;  %2079 = vmatprep.subr.bf16.mxu1 %v2078_v48 }
  0x8a   : > { %2051 = vmatprep.subr.bf16.mxu0 %v2050_v21  ;;  %v2082_v60 = vpack.c.bf16 %v326_v54, %v322_v53  ;;  %v321_v61 = vld [vmem:[#allocation8 + $0xd0] sm:$0xff]  ;;  %v2062_v63 = vpack.c.bf16 %v348_v56, %v344_v55  ;;  %v347_v1 = vld [vmem:[#allocation8 + $0x1a0] sm:$0xff]  ;;  %v330_v2 = vld [vmem:[#allocation8 + $0x118] sm:$0xff] }
  0x8b   : > { %v325_v62 = vld [vmem:[#allocation8 + $0xf0] sm:$0xff]  ;;  %v334_v3 = vld [vmem:[#allocation8 + $0x138] sm:$0xff]  ;;  %v352_v4 = vld [vmem:[#allocation8 + $0x1c8] sm:$0xff]  ;;  %2081 = vmatpush1.bf16.msra.mxu1 %v2080_v57  ;;  %v2064_v7 = vpack.c.bf16 %v347_v1, %v343_v59 }
  0x8c   : > { %v356_v5 = vld [vmem:[#allocation8 + $0x1e8] sm:$0xff]  ;;  %v2084_v6 = vpack.c.bf16 %v325_v62, %v321_v61  ;;  %v351_v8 = vld [vmem:[#allocation8 + $0x1c0] sm:$0xff]  ;;  %2083 = vmatprep.subr.bf16.mxu1 %v2082_v60  ;;  %v2086_v9 = vpack.c.bf16 %v334_v3, %v330_v2  ;;  %v329_v10 = vld [vmem:[#allocation8 + $0x110] sm:$0xff] }
  0x8d   : > { %2053 = vmatpush1.bf16.msra.mxu0 %v2052_v31  ;;  %v333_v11 = vld [vmem:[#allocation8 + $0x130] sm:$0xff]  ;;  %v2066_v12 = vpack.c.bf16 %v356_v5, %v352_v4  ;;  %v355_v13 = vld [vmem:[#allocation8 + $0x1e0] sm:$0xff]  ;;  %v338_v14 = vld [vmem:[#allocation8 + $0x158] sm:$0xff] }
  0x8e   : > { %2055 = vmatprep.subr.bf16.mxu0 %v2054_v36  ;;  %v342_v15 = vld [vmem:[#allocation8 + $0x178] sm:$0xff]  ;;  %v745_v16 = vld [vmem:[%s2733_s9] sm:$0xff]  ;;  %v2088_v17 = vpack.c.bf16 %v333_v11, %v329_v10  ;;  %v746_v18 = vld [vmem:[%s2733_s9 + $0x8] sm:$0xff]  ;;  %v2068_v19 = vpack.c.bf16 %v355_v13, %v351_v8 }
  0x8f   : > { %2085 = vmatpush1.bf16.msra.mxu1 %v2084_v6  ;;  %v2090_v20 = vpack.c.bf16 %v342_v15, %v338_v14  ;;  %v337_v21 = vld [vmem:[#allocation8 + $0x150] sm:$0xff]  ;;  %v346_v23 = vld [vmem:[#allocation8 + $0x198] sm:$0xff]  ;;  %v2747_v25 = vpack.c.bf16 %v746_v18, %v745_v16  ;;  %v279_v29 = vld [vmem:[%s2726_s8] sm:$0xff] }
  0x90   : > { %2087 = vmatprep.subr.bf16.mxu1 %v2086_v9  ;;  %v341_v22 = vld [vmem:[#allocation8 + $0x170] sm:$0xff]  ;;  %v350_v24 = vld [vmem:[#allocation8 + $0x1b8] sm:$0xff]  ;;  %v749_v37 = vld [vmem:[%s2733_s9 + $0x20] sm:$0xff] }
  0x91   : > { %2057 = vmatpush1.bf16.msra.mxu0 %v2056_v46  ;;  %v2092_v26 = vpack.c.bf16 %v341_v22, %v337_v21  ;;  %v747_v27 = vld [vmem:[%s2733_s9 + $0x10] sm:$0xff]  ;;  %v748_v28 = vld [vmem:[%s2733_s9 + $0x18] sm:$0xff]  ;;  %v2094_v30 = vpack.c.bf16 %v350_v24, %v346_v23  ;;  %v750_v38 = vld [vmem:[%s2733_s9 + $0x28] sm:$0xff] }
  0x92   : > { %2059 = vmatprep.subr.bf16.mxu0 %v2058_v51  ;;  %v345_v31 = vld [vmem:[#allocation8 + $0x190] sm:$0xff]  ;;  %v354_v33 = vld [vmem:[#allocation8 + $0x1d8] sm:$0xff]  ;;  %v2753_v35 = vpack.c.bf16 %v748_v28, %v747_v27  ;;  %v280_v39 = vld [vmem:[%s2726_s8 + $0x8] sm:$0xff]  ;;  %v2761_v43 = vpack.c.bf16 %v750_v38, %v749_v37 }
  0x93   : > { %2089 = vmatpush1.bf16.msra.mxu1 %v2088_v17  ;;  %v349_v32 = vld [vmem:[#allocation8 + $0x1b0] sm:$0xff]  ;;  %v358_v34 = vld [vmem:[#allocation8 + $0x1f8] sm:$0xff]  ;;  %v753_v49 = vld [vmem:[%s2733_s9 + $0x40] sm:$0xff] }
  0x94   : > { %2091 = vmatprep.subr.bf16.mxu1 %v2090_v20  ;;  %v2096_v36 = vpack.c.bf16 %v349_v32, %v345_v31  ;;  %v2098_v40 = vpack.c.bf16 %v358_v34, %v354_v33  ;;  %v353_v41 = vld [vmem:[#allocation8 + $0x1d0] sm:$0xff]  ;;  %v752_v46 = vld [vmem:[%s2733_s9 + $0x38] sm:$0xff]  ;;  %v754_v50 = vld [vmem:[%s2733_s9 + $0x48] sm:$0xff] }
  0x95   : > { %2061 = vmatpush1.bf16.msra.mxu0 %v2060_v58  ;;  %v357_v42 = vld [vmem:[#allocation8 + $0x1f0] sm:$0xff]  ;;  %v282_v51 = vld [vmem:[%s2726_s8 + $0x18] sm:$0xff]  ;;  %v2778_v52 = vpack.c.bf16 %v754_v50, %v753_v49  ;;  %v283_v55 = vld [vmem:[%s2726_s8 + $0x20] sm:$0xff] }
  0x96   : > { %2063 = vmatprep.subr.bf16.mxu0 %v2062_v63  ;;  %v2100_v44 = vpack.c.bf16 %v357_v42, %v353_v41  ;;  %v751_v45 = vld [vmem:[%s2733_s9 + $0x30] sm:$0xff]  ;;  %v756_v54 = vld [vmem:[%s2733_s9 + $0x58] sm:$0xff]  ;;  %v757_v57 = vld [vmem:[%s2733_s9 + $0x60] sm:$0xff] }
  0x97   : > { %2093 = vmatpush1.bf16.msra.mxu1 %v2092_v26  ;;  %v281_v47 = vld [vmem:[%s2726_s8 + $0x10] sm:$0xff]  ;;  %v2769_v48 = vpack.c.bf16 %v752_v46, %v751_v45  ;;  %v758_v58 = vld [vmem:[%s2733_s9 + $0x68] sm:$0xff]  ;;  %v286_v62 = vld [vmem:[%s2726_s8 + $0x38] sm:$0xff] }
  0x98   : > { %2095 = vmatprep.subr.bf16.mxu1 %v2094_v30  ;;  %v755_v53 = vld [vmem:[%s2733_s9 + $0x50] sm:$0xff]  ;;  %v284_v59 = vld [vmem:[%s2726_s8 + $0x28] sm:$0xff]  ;;  %v2800_v60 = vpack.c.bf16 %v758_v58, %v757_v57  ;;  %v287_v63 = vld [vmem:[%s2726_s8 + $0x40] sm:$0xff] }
  0x99   : > { %2065 = vmatpush1.bf16.msra.mxu0 %v2064_v7  ;;  %v2789_v56 = vpack.c.bf16 %v756_v54, %v755_v53  ;;  %v285_v61 = vld [vmem:[%s2726_s8 + $0x30] sm:$0xff]  ;;  %v288_v1 = vld [vmem:[%s2726_s8 + $0x48] sm:$0xff]  ;;  %v290_v3 = vld [vmem:[%s2726_s8 + $0x58] sm:$0xff] }
  0x9a   : > { %2067 = vmatprep.subr.bf16.mxu0 %v2066_v12  ;;  %v289_v2 = vld [vmem:[%s2726_s8 + $0x50] sm:$0xff]  ;;  %v291_v4 = vld [vmem:[%s2726_s8 + $0x60] sm:$0xff]  ;;  %v292_v5 = vld [vmem:[%s2726_s8 + $0x68] sm:$0xff] }
  0x9b   : > { %2097 = vmatpush1.bf16.msra.mxu1 %v2096_v36  ;;  %v293_v6 = vld [vmem:[%s2726_s8 + $0x70] sm:$0xff]  ;;  %v294_v7 = vld [vmem:[%s2726_s8 + $0x78] sm:$0xff] }
  0x9c   : > { %2099 = vmatprep.subr.bf16.mxu1 %v2098_v40  ;;  %v759_v8 = vld [vmem:[%s2733_s9 + $0x70] sm:$0xff]  ;;  %v760_v9 = vld [vmem:[%s2733_s9 + $0x78] sm:$0xff] }
  0x9d   : > { %2069 = vmatpush1.bf16.msra.mxu0 %v2068_v19  ;;  %v2849_v10 = vpack.c.bf16 %v760_v9, %v759_v8 }
  0x9e   : > { %2103 = vmatprep.subr.bf16.mxu0 %v2747_v25 }
  0x9f   : > { %2101 = vmatpush1.bf16.msra.mxu1 %v2100_v44 }
  0xa0   : > { %424 = vmatmul.mubr.f32.vlgmr.msra.gmra.mrb[0].mxu0 %v279_v29  ;;  %2135 = vmatprep.subr.bf16.mxu1 %v2747_v25 }
  0xa1   : > { %429 = vmatprep.mubr.f32.mxu0 %v2502_v0  ;;  %2105 = vmatpush3.bf16.msra.mxu0 %v2747_v25 }
  0xa2   : > { %2107 = vmatprep.subr.bf16.mxu0 %v2753_v35  ;;  %585 = vmatmul.mubr.f32.vlgmr.msra.gmra.mrb[0].mxu1 %v279_v29 }
  0xa3   : > { %590 = vmatprep.mubr.f32.mxu1 %v2502_v0  ;;  %2137 = vmatpush3.bf16.msra.mxu1 %v2747_v25 }
  0xa4   : > { %430 = vmatmul.mubr.f32.gmra.mrb[2].mxu0 %v280_v39  ;;  %2139 = vmatprep.subr.bf16.mxu1 %v2753_v35 }
  0xa5   : > { %435 = vmatprep.mubr.f32.mxu0 %v2502_v0  ;;  %2109 = vmatpush3.bf16.msra.mxu0 %v2753_v35 }
  0xa6   : > { %2111 = vmatprep.subr.bf16.mxu0 %v2761_v43  ;;  %591 = vmatmul.mubr.f32.gmra.mrb[2].mxu1 %v280_v39 }
  0xa7   : > { %596 = vmatprep.mubr.f32.mxu1 %v2502_v0  ;;  %2141 = vmatpush3.bf16.msra.mxu1 %v2753_v35 }
  0xa8   : > { %436 = vmatmul.mubr.f32.gmra.mrb[4].mxu0 %v281_v47  ;;  %2143 = vmatprep.subr.bf16.mxu1 %v2761_v43 }
  0xa9   : > { %441 = vmatprep.mubr.f32.mxu0 %v2502_v0  ;;  %2113 = vmatpush3.bf16.msra.mxu0 %v2761_v43 }
  0xaa   : > { %2115 = vmatprep.subr.bf16.mxu0 %v2769_v48  ;;  %597 = vmatmul.mubr.f32.gmra.mrb[4].mxu1 %v281_v47 }
  0xab   : > { %602 = vmatprep.mubr.f32.mxu1 %v2502_v0  ;;  %2145 = vmatpush3.bf16.msra.mxu1 %v2761_v43 }
  0xac   : > { %442 = vmatmul.mubr.f32.gmra.mrb[6].mxu0 %v282_v51  ;;  %2147 = vmatprep.subr.bf16.mxu1 %v2769_v48 }
  0xad   : > { %447 = vmatprep.mubr.f32.mxu0 %v2502_v0  ;;  %2117 = vmatpush3.bf16.msra.mxu0 %v2769_v48 }
  0xae   : > { %2119 = vmatprep.subr.bf16.mxu0 %v2778_v52  ;;  %603 = vmatmul.mubr.f32.gmra.mrb[6].mxu1 %v282_v51 }
  0xaf   : > { %608 = vmatprep.mubr.f32.mxu1 %v2502_v0  ;;  %2149 = vmatpush3.bf16.msra.mxu1 %v2769_v48 }
  0xb0   : > { %448 = vmatmul.mubr.f32.gmra.mrb[8].mxu0 %v283_v55  ;;  %2151 = vmatprep.subr.bf16.mxu1 %v2778_v52 }
  0xb1   : > { %453 = vmatprep.mubr.f32.mxu0 %v2502_v0  ;;  %2121 = vmatpush3.bf16.msra.mxu0 %v2778_v52 }
  0xb2   : > { %2123 = vmatprep.subr.bf16.mxu0 %v2789_v56  ;;  %609 = vmatmul.mubr.f32.gmra.mrb[8].mxu1 %v283_v55 }
  0xb3   : > { %614 = vmatprep.mubr.f32.mxu1 %v2502_v0  ;;  %2153 = vmatpush3.bf16.msra.mxu1 %v2778_v52 }
  0xb4   : > { %454 = vmatmul.mubr.f32.gmra.mrb[10].mxu0 %v284_v59  ;;  %2155 = vmatprep.subr.bf16.mxu1 %v2789_v56 }
  0xb5   : > { %459 = vmatprep.mubr.f32.mxu0 %v2502_v0  ;;  %2125 = vmatpush3.bf16.msra.mxu0 %v2789_v56 }
  0xb6   : > { %2127 = vmatprep.subr.bf16.mxu0 %v2800_v60  ;;  %615 = vmatmul.mubr.f32.gmra.mrb[10].mxu1 %v284_v59 }
  0xb7   : > { %620 = vmatprep.mubr.f32.mxu1 %v2502_v0  ;;  %2157 = vmatpush3.bf16.msra.mxu1 %v2789_v56 }
  0xb8   : > { %460 = vmatmul.mubr.f32.gmra.mrb[12].mxu0 %v285_v61  ;;  %2159 = vmatprep.subr.bf16.mxu1 %v2800_v60 }
  0xb9   : > { %465 = vmatprep.mubr.f32.mxu0 %v2502_v0  ;;  %2129 = vmatpush3.bf16.msra.mxu0 %v2800_v60 }
  0xba   : > { %621 = vmatmul.mubr.f32.gmra.mrb[12].mxu1 %v285_v61  ;;  %2131 = vmatprep.subr.bf16.mxu0 %v2849_v10 }
  0xbb   : > { %626 = vmatprep.mubr.f32.mxu1 %v2502_v0  ;;  %2161 = vmatpush3.bf16.msra.mxu1 %v2800_v60 }
  0xbc   : > { %466 = vmatmul.mubr.f32.gmra.mrb[14].mxu0 %v286_v62  ;;  %2163 = vmatprep.subr.bf16.mxu1 %v2849_v10 }
  0xbd   : > { %471 = vmatprep.mubr.f32.mxu0 %v2502_v0  ;;  %2133 = vmatpush3.bf16.msra.mxu0 %v2849_v10 }
  0xbe   : > { %627 = vmatmul.mubr.f32.gmra.mrb[14].mxu1 %v286_v62  ;;  %2167 = vmatprep.subr.bf16.mxu0 %v2747_v25 }
  0xbf   : > { %632 = vmatprep.mubr.f32.mxu1 %v2502_v0  ;;  %2165 = vmatpush3.bf16.msra.mxu1 %v2849_v10 }
  0xc0   : > { %472 = vmatmul.mubr.f32.gmra.mrb[16].mxu0 %v287_v63  ;;  %2199 = vmatprep.subr.bf16.mxu1 %v2747_v25 }
  0xc1   : > { %477 = vmatprep.mubr.f32.mxu0 %v2502_v0 }
  0xc2   : > { %633 = vmatmul.mubr.f32.gmra.mrb[16].mxu1 %v287_v63 }
  0xc3   : > { %638 = vmatprep.mubr.f32.mxu1 %v2502_v0 }
  0xc4   : > { %478 = vmatmul.mubr.f32.gmra.mrb[18].mxu0 %v288_v1 }
  0xc5   : > { %483 = vmatprep.mubr.f32.mxu0 %v2502_v0 }
  0xc6   : > { %639 = vmatmul.mubr.f32.gmra.mrb[18].mxu1 %v288_v1 }
  0xc7   : > { %644 = vmatprep.mubr.f32.mxu1 %v2502_v0 }
  0xc8   : > { %484 = vmatmul.mubr.f32.gmra.mrb[20].mxu0 %v289_v2 }
  0xc9   : > { %489 = vmatprep.mubr.f32.mxu0 %v2502_v0 }
  0xca   : > { %645 = vmatmul.mubr.f32.gmra.mrb[20].mxu1 %v289_v2 }
  0xcb   : > { %650 = vmatprep.mubr.f32.mxu1 %v2502_v0 }
  0xcc   : > { %490 = vmatmul.mubr.f32.gmra.mrb[22].mxu0 %v290_v3 }
  0xcd   : > { %495 = vmatprep.mubr.f32.mxu0 %v2502_v0 }
  0xce   : > { %651 = vmatmul.mubr.f32.gmra.mrb[22].mxu1 %v290_v3 }
  0xcf   : > { %656 = vmatprep.mubr.f32.mxu1 %v2502_v0 }
  0xd0   : > { %496 = vmatmul.mubr.f32.gmra.mrb[24].mxu0 %v291_v4 }
  0xd1   : > { %501 = vmatprep.mubr.f32.mxu0 %v2502_v0 }
  0xd2   : > { %657 = vmatmul.mubr.f32.gmra.mrb[24].mxu1 %v291_v4 }
  0xd3   : > { %662 = vmatprep.mubr.f32.mxu1 %v2502_v0 }
  0xd4   : > { %502 = vmatmul.mubr.f32.gmra.mrb[26].mxu0 %v292_v5 }
  0xd5   : > { %507 = vmatprep.mubr.f32.mxu0 %v2502_v0 }
  0xd6   : > { %663 = vmatmul.mubr.f32.gmra.mrb[26].mxu1 %v292_v5 }
  0xd7   : > { %668 = vmatprep.mubr.f32.mxu1 %v2502_v0 }
  0xd8   : > { %508 = vmatmul.mubr.f32.gmra.mrb[28].mxu0 %v293_v6 }
  0xd9   : > { %513 = vmatprep.mubr.f32.mxu0 %v2502_v0 }
  0xda   : > { %669 = vmatmul.mubr.f32.gmra.mrb[28].mxu1 %v293_v6 }
  0xdb   : > { %674 = vmatprep.mubr.f32.mxu1 %v2502_v0 }
  0xdc   : > { %514 = vmatmul.mubr.f32.gmra.mrb[30].mxu0 %v294_v7 }
  0xde   : > { %675 = vmatmul.mubr.f32.gmra.mrb[30].mxu1 %v294_v7 }
 0x173   : > { %v425_v11 = vpop.f32.mrb[0].mxu0 }
 0x174   : > { %v427_v12 = vpop.f32.mrb[1].mxu0  ;;  %1846 = vmatprep.mubr.f32.mxu0 %v425_v11 }
 0x175   : > { %1902 = vmatprep.mubr.f32.mxu1 %v427_v12  ;;  %v2862_v16 = vpop.f32.mrb[0].mxu1 }
 0x176   : > { %v2866_v18 = vpop.f32.mrb[1].mxu1 }
 0x177   : > { %v431_v0 = vpop.f32.mrb[2].mxu0 }
 0x178   : > { %v433_v13 = vpop.f32.mrb[3].mxu0  ;;  %1847 = vmatmul.mubr.f32.vlgmr.msra.gmra.mrb[32].mxu0 %v431_v0 }
 0x179   : > { %1903 = vmatmul.mubr.f32.vlgmr.msra.gmra.mrb[32].mxu1 %v433_v13  ;;  %2169 = vmatpush3.bf16.msra.mxu0 %v2747_v25  ;;  %v2870_v20 = vpop.f32.mrb[2].mxu1 }
 0x17a   : > { %2201 = vmatpush3.bf16.msra.mxu1 %v2747_v25  ;;  %2171 = vmatprep.subr.bf16.mxu0 %v2753_v35  ;;  %v2874_v22 = vpop.f32.mrb[3].mxu1 }
 0x17b   : > { %v437_v14 = vpop.f32.mrb[4].mxu0  ;;  %2203 = vmatprep.subr.bf16.mxu1 %v2753_v35 }
 0x17c   : > { %v439_v15 = vpop.f32.mrb[5].mxu0  ;;  %1849 = vmatprep.mubr.f32.mxu0 %v437_v14 }
 0x17d   : > { %1905 = vmatprep.mubr.f32.mxu1 %v439_v15  ;;  %2173 = vmatpush3.bf16.msra.mxu0 %v2753_v35  ;;  %v2878_v24 = vpop.f32.mrb[4].mxu1 }
 0x17e   : > { %2205 = vmatpush3.bf16.msra.mxu1 %v2753_v35  ;;  %2175 = vmatprep.subr.bf16.mxu0 %v2761_v43  ;;  %v2882_v26 = vpop.f32.mrb[5].mxu1 }
 0x17f   : > { %v443_v17 = vpop.f32.mrb[6].mxu0  ;;  %2207 = vmatprep.subr.bf16.mxu1 %v2761_v43 }
 0x180   : > { %v445_v19 = vpop.f32.mrb[7].mxu0  ;;  %1850 = vmatmul.mubr.f32.gmra.mrb[34].mxu0 %v443_v17 }
 0x181   : > { %1906 = vmatmul.mubr.f32.gmra.mrb[34].mxu1 %v445_v19  ;;  %2177 = vmatpush3.bf16.msra.mxu0 %v2761_v43  ;;  %v2886_v28 = vpop.f32.mrb[6].mxu1 }
 0x182   : > { %2209 = vmatpush3.bf16.msra.mxu1 %v2761_v43  ;;  %2179 = vmatprep.subr.bf16.mxu0 %v2769_v48  ;;  %v2890_v30 = vpop.f32.mrb[7].mxu1 }
 0x183   : > { %v449_v21 = vpop.f32.mrb[8].mxu0  ;;  %2211 = vmatprep.subr.bf16.mxu1 %v2769_v48 }
 0x184   : > { %v451_v23 = vpop.f32.mrb[9].mxu0  ;;  %1852 = vmatprep.mubr.f32.mxu0 %v449_v21 }
 0x185   : > { %1908 = vmatprep.mubr.f32.mxu1 %v451_v23  ;;  %2181 = vmatpush3.bf16.msra.mxu0 %v2769_v48  ;;  %v2894_v32 = vpop.f32.mrb[8].mxu1 }
 0x186   : > { %2213 = vmatpush3.bf16.msra.mxu1 %v2769_v48  ;;  %2183 = vmatprep.subr.bf16.mxu0 %v2778_v52  ;;  %v2898_v34 = vpop.f32.mrb[9].mxu1 }
 0x187   : > { %v455_v25 = vpop.f32.mrb[10].mxu0  ;;  %2215 = vmatprep.subr.bf16.mxu1 %v2778_v52 }
 0x188   : > { %v457_v27 = vpop.f32.mrb[11].mxu0  ;;  %1853 = vmatmul.mubr.f32.gmra.mrb[36].mxu0 %v455_v25 }
 0x189   : > { %1909 = vmatmul.mubr.f32.gmra.mrb[36].mxu1 %v457_v27  ;;  %2185 = vmatpush3.bf16.msra.mxu0 %v2778_v52  ;;  %v2902_v36 = vpop.f32.mrb[10].mxu1 }
 0x18a   : > { %2217 = vmatpush3.bf16.msra.mxu1 %v2778_v52  ;;  %2187 = vmatprep.subr.bf16.mxu0 %v2789_v56  ;;  %v2906_v38 = vpop.f32.mrb[11].mxu1 }
 0x18b   : > { %v461_v29 = vpop.f32.mrb[12].mxu0  ;;  %2219 = vmatprep.subr.bf16.mxu1 %v2789_v56 }
 0x18c   : > { %v463_v31 = vpop.f32.mrb[13].mxu0  ;;  %1855 = vmatprep.mubr.f32.mxu0 %v461_v29 }
 0x18d   : > { %1911 = vmatprep.mubr.f32.mxu1 %v463_v31  ;;  %2189 = vmatpush3.bf16.msra.mxu0 %v2789_v56  ;;  %v622_v40 = vpop.f32.mrb[12].mxu1 }
 0x18e   : > { %2221 = vmatpush3.bf16.msra.mxu1 %v2789_v56  ;;  %2191 = vmatprep.subr.bf16.mxu0 %v2800_v60  ;;  %v624_v42 = vpop.f32.mrb[13].mxu1 }
 0x18f   : > { %v467_v33 = vpop.f32.mrb[14].mxu0  ;;  %2223 = vmatprep.subr.bf16.mxu1 %v2800_v60 }
 0x190   : > { %v469_v35 = vpop.f32.mrb[15].mxu0  ;;  %1856 = vmatmul.mubr.f32.gmra.mrb[38].mxu0 %v467_v33 }
 0x191   : > { %1912 = vmatmul.mubr.f32.gmra.mrb[38].mxu1 %v469_v35  ;;  %2193 = vmatpush3.bf16.msra.mxu0 %v2800_v60  ;;  %v628_v44 = vpop.f32.mrb[14].mxu1 }
 0x192   : > { %2225 = vmatpush3.bf16.msra.mxu1 %v2800_v60  ;;  %2195 = vmatprep.subr.bf16.mxu0 %v2849_v10  ;;  %v630_v46 = vpop.f32.mrb[15].mxu1 }
 0x193   : > { %v473_v37 = vpop.f32.mrb[16].mxu0  ;;  %2227 = vmatprep.subr.bf16.mxu1 %v2849_v10 }
 0x194   : > { %v475_v39 = vpop.f32.mrb[17].mxu0  ;;  %1858 = vmatprep.mubr.f32.mxu0 %v473_v37 }
 0x195   : > { %1914 = vmatprep.mubr.f32.mxu1 %v475_v39  ;;  %2197 = vmatpush3.bf16.msra.mxu0 %v2849_v10  ;;  %v634_v48 = vpop.f32.mrb[16].mxu1 }
 0x196   : > { %2229 = vmatpush3.bf16.msra.mxu1 %v2849_v10  ;;  %v636_v50 = vpop.f32.mrb[17].mxu1 }
 0x197   : > { %v479_v41 = vpop.f32.mrb[18].mxu0 }
 0x198   : > { %v481_v43 = vpop.f32.mrb[19].mxu0  ;;  %1859 = vmatmul.mubr.f32.gmra.mrb[40].mxu0 %v479_v41 }
 0x199   : > { %1915 = vmatmul.mubr.f32.gmra.mrb[40].mxu1 %v481_v43  ;;  %v640_v52 = vpop.f32.mrb[18].mxu1 }
 0x19a   : > { %v642_v54 = vpop.f32.mrb[19].mxu1 }
 0x19b   : > { %v485_v45 = vpop.f32.mrb[20].mxu0 }
 0x19c   : > { %v487_v47 = vpop.f32.mrb[21].mxu0  ;;  %1861 = vmatprep.mubr.f32.mxu0 %v485_v45 }
 0x19d   : > { %1917 = vmatprep.mubr.f32.mxu1 %v487_v47  ;;  %v646_v56 = vpop.f32.mrb[20].mxu1 }
 0x19e   : > { %v648_v58 = vpop.f32.mrb[21].mxu1 }
 0x19f   : > { %v491_v49 = vpop.f32.mrb[22].mxu0 }
 0x1a0   : > { %v493_v51 = vpop.f32.mrb[23].mxu0  ;;  %1862 = vmatmul.mubr.f32.gmra.mrb[42].mxu0 %v491_v49 }
 0x1a1   : > { %1918 = vmatmul.mubr.f32.gmra.mrb[42].mxu1 %v493_v51  ;;  %v652_v60 = vpop.f32.mrb[22].mxu1 }
 0x1a2   : > { %v654_v62 = vpop.f32.mrb[23].mxu1 }
 0x1a3   : > { %v497_v53 = vpop.f32.mrb[24].mxu0 }
 0x1a4   : > { %v499_v55 = vpop.f32.mrb[25].mxu0  ;;  %1864 = vmatprep.mubr.f32.mxu0 %v497_v53 }
 0x1a5   : > { %1920 = vmatprep.mubr.f32.mxu1 %v499_v55  ;;  %v658_v1 = vpop.f32.mrb[24].mxu1 }
 0x1a6   : > { %v660_v3 = vpop.f32.mrb[25].mxu1 }
 0x1a7   : > { %v503_v57 = vpop.f32.mrb[26].mxu0 }
 0x1a8   : > { %v505_v59 = vpop.f32.mrb[27].mxu0  ;;  %1865 = vmatmul.mubr.f32.gmra.mrb[44].mxu0 %v503_v57 }
 0x1a9   : > { %1921 = vmatmul.mubr.f32.gmra.mrb[44].mxu1 %v505_v59  ;;  %v664_v5 = vpop.f32.mrb[26].mxu1 }
 0x1aa   : > { %v666_v6 = vpop.f32.mrb[27].mxu1 }
 0x1ab   : > { %v509_v61 = vpop.f32.mrb[28].mxu0 }
 0x1ac   : > { %v511_v63 = vpop.f32.mrb[29].mxu0  ;;  %1867 = vmatprep.mubr.f32.mxu0 %v509_v61 }
 0x1ad   : > { %1923 = vmatprep.mubr.f32.mxu1 %v511_v63  ;;  %v670_v7 = vpop.f32.mrb[28].mxu1 }
 0x1ae   : > { %v672_v8 = vpop.f32.mrb[29].mxu1 }
 0x1af   : > { %v515_v2 = vpop.f32.mrb[30].mxu0 }
 0x1b0   : > { %v517_v4 = vpop.f32.mrb[31].mxu0  ;;  %1868 = vmatmul.mubr.f32.gmra.mrb[46].mxu0 %v515_v2 }
 0x1b1   : > { %1924 = vmatmul.mubr.f32.gmra.mrb[46].mxu1 %v517_v4  ;;  %1958 = vmatprep.mubr.f32.mxu0 %v2862_v16  ;;  %v676_v9 = vpop.f32.mrb[30].mxu1 }
 0x1b2   : > { %2014 = vmatprep.mubr.f32.mxu1 %v2866_v18  ;;  %v678_v10 = vpop.f32.mrb[31].mxu1 }
 0x1b4   : > { %1959 = vmatmul.mubr.f32.vlgmr.msra.gmra.mrb[48].mxu0 %v2870_v20 }
 0x1b5   : > { %1961 = vmatprep.mubr.f32.mxu0 %v2878_v24  ;;  %2015 = vmatmul.mubr.f32.vlgmr.msra.gmra.mrb[48].mxu1 %v2874_v22 }
 0x1b6   : > { %2017 = vmatprep.mubr.f32.mxu1 %v2882_v26 }
 0x1b8   : > { %1962 = vmatmul.mubr.f32.gmra.mrb[50].mxu0 %v2886_v28 }
 0x1b9   : > { %1964 = vmatprep.mubr.f32.mxu0 %v2894_v32  ;;  %2018 = vmatmul.mubr.f32.gmra.mrb[50].mxu1 %v2890_v30 }
 0x1ba   : > { %2020 = vmatprep.mubr.f32.mxu1 %v2898_v34 }
 0x1bc   : > { %1965 = vmatmul.mubr.f32.gmra.mrb[52].mxu0 %v2902_v36 }
 0x1bd   : > { %1967 = vmatprep.mubr.f32.mxu0 %v622_v40  ;;  %2021 = vmatmul.mubr.f32.gmra.mrb[52].mxu1 %v2906_v38 }
 0x1be   : > { %2023 = vmatprep.mubr.f32.mxu1 %v624_v42 }
 0x1c0   : > { %1968 = vmatmul.mubr.f32.gmra.mrb[54].mxu0 %v628_v44 }
 0x1c1   : > { %1970 = vmatprep.mubr.f32.mxu0 %v634_v48  ;;  %2024 = vmatmul.mubr.f32.gmra.mrb[54].mxu1 %v630_v46 }
 0x1c2   : > { %2026 = vmatprep.mubr.f32.mxu1 %v636_v50 }
 0x1c4   : > { %1971 = vmatmul.mubr.f32.gmra.mrb[56].mxu0 %v640_v52 }
 0x1c5   : > { %1973 = vmatprep.mubr.f32.mxu0 %v646_v56  ;;  %2027 = vmatmul.mubr.f32.gmra.mrb[56].mxu1 %v642_v54 }
 0x1c6   : > { %2029 = vmatprep.mubr.f32.mxu1 %v648_v58 }
 0x1c8   : > { %1974 = vmatmul.mubr.f32.gmra.mrb[58].mxu0 %v652_v60 }
 0x1c9   : > { %1976 = vmatprep.mubr.f32.mxu0 %v658_v1  ;;  %2030 = vmatmul.mubr.f32.gmra.mrb[58].mxu1 %v654_v62 }
 0x1ca   : > { %2032 = vmatprep.mubr.f32.mxu1 %v660_v3 }
 0x1cc   : > { %1977 = vmatmul.mubr.f32.gmra.mrb[60].mxu0 %v664_v5 }
 0x1cd   : > { %1979 = vmatprep.mubr.f32.mxu0 %v670_v7  ;;  %2033 = vmatmul.mubr.f32.gmra.mrb[60].mxu1 %v666_v6 }
 0x1ce   : > { %2035 = vmatprep.mubr.f32.mxu1 %v672_v8 }
 0x1d0   : > { %1980 = vmatmul.mubr.f32.gmra.mrb[62].mxu0 %v676_v9 }
 0x1d1   : > { %2036 = vmatmul.mubr.f32.gmra.mrb[62].mxu1 %v678_v10 }
 0x24b   : > { %v1848_v11 = vpop.f32.mrb[32].mxu0 }
 0x24c   : > { %923 = vst [vmem:[%s2924_s20 + $0x8] sm:$0xff] %v1848_v11  ;;  %v843_v12 = vpop.f32.mrb[33].mxu0  ;;  %v1904_v0 = vpop.f32.mrb[32].mxu1 }
 0x24d   : > { %922 = vst [vmem:[%s2924_s20] sm:$0xff] %v843_v12  ;;  %1631 = vst [vmem:[%s2924_s20 + $0x88] sm:$0xff] %v1904_v0  ;;  %v1020_v13 = vpop.f32.mrb[33].mxu1 }
 0x24e   : > { %1630 = vst [vmem:[%s2924_s20 + $0x80] sm:$0xff] %v1020_v13 }
 0x253   : > { %v1851_v14 = vpop.f32.mrb[34].mxu0 }
 0x254   : > { %925 = vst [vmem:[%s2924_s20 + $0x18] sm:$0xff] %v1851_v14  ;;  %v853_v15 = vpop.f32.mrb[35].mxu0  ;;  %v1907_v16 = vpop.f32.mrb[34].mxu1 }
 0x255   : > { %924 = vst [vmem:[%s2924_s20 + $0x10] sm:$0xff] %v853_v15  ;;  %1633 = vst [vmem:[%s2924_s20 + $0x98] sm:$0xff] %v1907_v16  ;;  %v1030_v17 = vpop.f32.mrb[35].mxu1 }
 0x256   : > { %1632 = vst [vmem:[%s2924_s20 + $0x90] sm:$0xff] %v1030_v17 }
 0x25b   : > { %v1854_v18 = vpop.f32.mrb[36].mxu0 }
 0x25c   : > { %927 = vst [vmem:[%s2924_s20 + $0x28] sm:$0xff] %v1854_v18  ;;  %v863_v19 = vpop.f32.mrb[37].mxu0  ;;  %v1910_v20 = vpop.f32.mrb[36].mxu1 }
 0x25d   : > { %926 = vst [vmem:[%s2924_s20 + $0x20] sm:$0xff] %v863_v19  ;;  %1635 = vst [vmem:[%s2924_s20 + $0xa8] sm:$0xff] %v1910_v20  ;;  %v1040_v21 = vpop.f32.mrb[37].mxu1 }
 0x25e   : > { %1634 = vst [vmem:[%s2924_s20 + $0xa0] sm:$0xff] %v1040_v21 }
 0x263   : > { %v1857_v22 = vpop.f32.mrb[38].mxu0 }
 0x264   : > { %929 = vst [vmem:[%s2924_s20 + $0x38] sm:$0xff] %v1857_v22  ;;  %v873_v23 = vpop.f32.mrb[39].mxu0  ;;  %v1913_v24 = vpop.f32.mrb[38].mxu1 }
 0x265   : > { %928 = vst [vmem:[%s2924_s20 + $0x30] sm:$0xff] %v873_v23  ;;  %1637 = vst [vmem:[%s2924_s20 + $0xb8] sm:$0xff] %v1913_v24  ;;  %v1050_v25 = vpop.f32.mrb[39].mxu1 }
 0x266   : > { %1636 = vst [vmem:[%s2924_s20 + $0xb0] sm:$0xff] %v1050_v25 }
 0x26b   : > { %v1860_v26 = vpop.f32.mrb[40].mxu0 }
 0x26c   : > { %931 = vst [vmem:[%s2924_s20 + $0x48] sm:$0xff] %v1860_v26  ;;  %v883_v27 = vpop.f32.mrb[41].mxu0  ;;  %v1916_v28 = vpop.f32.mrb[40].mxu1 }
 0x26d   : > { %930 = vst [vmem:[%s2924_s20 + $0x40] sm:$0xff] %v883_v27  ;;  %1639 = vst [vmem:[%s2924_s20 + $0xc8] sm:$0xff] %v1916_v28  ;;  %v1060_v29 = vpop.f32.mrb[41].mxu1 }
 0x26e   : > { %1638 = vst [vmem:[%s2924_s20 + $0xc0] sm:$0xff] %v1060_v29 }
 0x273   : > { %v1863_v30 = vpop.f32.mrb[42].mxu0 }
 0x274   : > { %933 = vst [vmem:[%s2924_s20 + $0x58] sm:$0xff] %v1863_v30  ;;  %v893_v31 = vpop.f32.mrb[43].mxu0  ;;  %v1919_v32 = vpop.f32.mrb[42].mxu1 }
 0x275   : > { %932 = vst [vmem:[%s2924_s20 + $0x50] sm:$0xff] %v893_v31  ;;  %1641 = vst [vmem:[%s2924_s20 + $0xd8] sm:$0xff] %v1919_v32  ;;  %v1070_v33 = vpop.f32.mrb[43].mxu1 }
 0x276   : > { %1640 = vst [vmem:[%s2924_s20 + $0xd0] sm:$0xff] %v1070_v33 }
 0x27b   : > { %v1866_v34 = vpop.f32.mrb[44].mxu0 }
 0x27c   : > { %935 = vst [vmem:[%s2924_s20 + $0x68] sm:$0xff] %v1866_v34  ;;  %v903_v35 = vpop.f32.mrb[45].mxu0  ;;  %v1922_v36 = vpop.f32.mrb[44].mxu1 }
 0x27d   : > { %934 = vst [vmem:[%s2924_s20 + $0x60] sm:$0xff] %v903_v35  ;;  %1643 = vst [vmem:[%s2924_s20 + $0xe8] sm:$0xff] %v1922_v36  ;;  %v1080_v37 = vpop.f32.mrb[45].mxu1 }
 0x27e   : > { %1642 = vst [vmem:[%s2924_s20 + $0xe0] sm:$0xff] %v1080_v37 }
 0x283   : > { %v1869_v38 = vpop.f32.mrb[46].mxu0 }
 0x284   : > { %937 = vst [vmem:[%s2924_s20 + $0x78] sm:$0xff] %v1869_v38  ;;  %v913_v39 = vpop.f32.mrb[47].mxu0  ;;  %v1925_v40 = vpop.f32.mrb[46].mxu1 }
 0x285   : > { %936 = vst [vmem:[%s2924_s20 + $0x70] sm:$0xff] %v913_v39  ;;  %1645 = vst [vmem:[%s2924_s20 + $0xf8] sm:$0xff] %v1925_v40  ;;  %v1090_v41 = vpop.f32.mrb[47].mxu1 }
 0x286   : > { %1644 = vst [vmem:[%s2924_s20 + $0xf0] sm:$0xff] %v1090_v41 }
 0x287   : > { %v1960_v42 = vpop.f32.mrb[48].mxu0 }
 0x288   : > { %1647 = vst [vmem:[%s2924_s20 + $0x108] sm:$0xff] %v1960_v42  ;;  %v1198_v43 = vpop.f32.mrb[49].mxu0  ;;  %v2016_v44 = vpop.f32.mrb[48].mxu1 }
 0x289   : > { %1646 = vst [vmem:[%s2924_s20 + $0x100] sm:$0xff] %v1198_v43  ;;  %1663 = vst [vmem:[%s2924_s20 + $0x188] sm:$0xff] %v2016_v44  ;;  %v1376_v45 = vpop.f32.mrb[49].mxu1 }
 0x28a   : > { %1662 = vst [vmem:[%s2924_s20 + $0x180] sm:$0xff] %v1376_v45 }
 0x28b   : > { %v1963_v46 = vpop.f32.mrb[50].mxu0 }
 0x28c   : > { %1649 = vst [vmem:[%s2924_s20 + $0x118] sm:$0xff] %v1963_v46  ;;  %v1208_v47 = vpop.f32.mrb[51].mxu0  ;;  %v2019_v48 = vpop.f32.mrb[50].mxu1 }
 0x28d   : > { %1648 = vst [vmem:[%s2924_s20 + $0x110] sm:$0xff] %v1208_v47  ;;  %1665 = vst [vmem:[%s2924_s20 + $0x198] sm:$0xff] %v2019_v48  ;;  %v1386_v49 = vpop.f32.mrb[51].mxu1 }
 0x28e   : > { %1664 = vst [vmem:[%s2924_s20 + $0x190] sm:$0xff] %v1386_v49 }
 0x28f   : > { %v1966_v50 = vpop.f32.mrb[52].mxu0 }
 0x290   : > { %1651 = vst [vmem:[%s2924_s20 + $0x128] sm:$0xff] %v1966_v50  ;;  %v1218_v51 = vpop.f32.mrb[53].mxu0  ;;  %v2022_v52 = vpop.f32.mrb[52].mxu1 }
 0x291   : > { %1650 = vst [vmem:[%s2924_s20 + $0x120] sm:$0xff] %v1218_v51  ;;  %1667 = vst [vmem:[%s2924_s20 + $0x1a8] sm:$0xff] %v2022_v52  ;;  %v1396_v53 = vpop.f32.mrb[53].mxu1 }
 0x292   : > { %1666 = vst [vmem:[%s2924_s20 + $0x1a0] sm:$0xff] %v1396_v53 }
 0x293   : > { %v1969_v54 = vpop.f32.mrb[54].mxu0 }
 0x294   : > { %1653 = vst [vmem:[%s2924_s20 + $0x138] sm:$0xff] %v1969_v54  ;;  %v1228_v55 = vpop.f32.mrb[55].mxu0  ;;  %v2025_v56 = vpop.f32.mrb[54].mxu1 }
 0x295   : > { %1652 = vst [vmem:[%s2924_s20 + $0x130] sm:$0xff] %v1228_v55  ;;  %1669 = vst [vmem:[%s2924_s20 + $0x1b8] sm:$0xff] %v2025_v56  ;;  %v1406_v57 = vpop.f32.mrb[55].mxu1 }
 0x296   : > { %1668 = vst [vmem:[%s2924_s20 + $0x1b0] sm:$0xff] %v1406_v57 }
 0x297   : > { %v1972_v58 = vpop.f32.mrb[56].mxu0 }
 0x298   : > { %1655 = vst [vmem:[%s2924_s20 + $0x148] sm:$0xff] %v1972_v58  ;;  %v1238_v59 = vpop.f32.mrb[57].mxu0  ;;  %v2028_v60 = vpop.f32.mrb[56].mxu1 }
 0x299   : > { %1654 = vst [vmem:[%s2924_s20 + $0x140] sm:$0xff] %v1238_v59  ;;  %1671 = vst [vmem:[%s2924_s20 + $0x1c8] sm:$0xff] %v2028_v60  ;;  %v1416_v61 = vpop.f32.mrb[57].mxu1 }
 0x29a   : > { %1670 = vst [vmem:[%s2924_s20 + $0x1c0] sm:$0xff] %v1416_v61 }
 0x29b   : > { %v1975_v62 = vpop.f32.mrb[58].mxu0 }
 0x29c   : > { %1657 = vst [vmem:[%s2924_s20 + $0x158] sm:$0xff] %v1975_v62  ;;  %v1248_v63 = vpop.f32.mrb[59].mxu0  ;;  %v2031_v1 = vpop.f32.mrb[58].mxu1 }
 0x29d   : > { %1656 = vst [vmem:[%s2924_s20 + $0x150] sm:$0xff] %v1248_v63  ;;  %1673 = vst [vmem:[%s2924_s20 + $0x1d8] sm:$0xff] %v2031_v1  ;;  %v1426_v2 = vpop.f32.mrb[59].mxu1 }
 0x29e   : > { %1672 = vst [vmem:[%s2924_s20 + $0x1d0] sm:$0xff] %v1426_v2 }
 0x29f   : > { %v1978_v3 = vpop.f32.mrb[60].mxu0 }
 0x2a0   : > { %1659 = vst [vmem:[%s2924_s20 + $0x168] sm:$0xff] %v1978_v3  ;;  %v1258_v4 = vpop.f32.mrb[61].mxu0  ;;  %v2034_v5 = vpop.f32.mrb[60].mxu1 }
 0x2a1   : > { %1658 = vst [vmem:[%s2924_s20 + $0x160] sm:$0xff] %v1258_v4  ;;  %1675 = vst [vmem:[%s2924_s20 + $0x1e8] sm:$0xff] %v2034_v5  ;;  %v1436_v6 = vpop.f32.mrb[61].mxu1 }
 0x2a2   : > { %1674 = vst [vmem:[%s2924_s20 + $0x1e0] sm:$0xff] %v1436_v6 }
 0x2a3   : > { %v1981_v7 = vpop.f32.mrb[62].mxu0 }
 0x2a4   : > { %1661 = vst [vmem:[%s2924_s20 + $0x178] sm:$0xff] %v1981_v7  ;;  %v1268_v8 = vpop.f32.mrb[63].mxu0  ;;  %v2037_v9 = vpop.f32.mrb[62].mxu1 }
 0x2a5   : > { %1660 = vst [vmem:[%s2924_s20 + $0x170] sm:$0xff] %v1268_v8  ;;  %1677 = vst [vmem:[%s2924_s20 + $0x1f8] sm:$0xff] %v2037_v9  ;;  %v1446_v10 = vpop.f32.mrb[63].mxu1 }
 0x2a6   : > { %1676 = vst [vmem:[%s2924_s20 + $0x1f0] sm:$0xff] %v1446_v10 }
 0x2a7   : > { %2416 = shalt.err (!%p2413_p8)
}
 0x2a8   : > { %s2417_s27 = scalar_lea.hbm %s2991_s10, 8192  ;;  %s2421_s8 = scalar_lea.hbm %s3049_s3, 16384 }
 0x2a9   : > { %p2418_p12 = scmp.ne.s32.totalorder %s2991_s10, %s2417_s27  ;;  %p2422_p6 = scmp.lt.u32.totalorder %s2991_s10, %s3049_s3 }
 0x2aa   : > { %p2423_p13 = scmp.lt.u32.totalorder %s2421_s8, %s2417_s27  ;;  %p2425_p5 = scmp.lt.u32.totalorder %s2417_s27, %s2991_s10 }
 0x2ab   : > { %p2419_p11 = pnand %p2418_p12, %p2618_p10 }
 0x2ac   : > { %p2424_p0 = por %p2423_p13, %p2422_p6 }
 0x2ad   : > { %p2420_p3 = pneg %p2419_p11 }
 0x2ae   : > { %p2426_p9 = por %p2425_p5, %p2424_p0 }
 0x2b0   : > { %p2427_p1 = pnand %p2426_p9, %p2420_p3 }
 0x2b2   : > { %2430 = shalt.err (!%p2427_p1)
}
 0x2b3   : > { %s2504_s9 = smov 128   ;;  %s2505_s18 = smov 8  }
 0x2b4   : > { %2238 = dma.vmem_to_hbm [thread:$0]  (%p2618_p10), %s2993_s23, 8192, %s2991_s10, %s1473_s15, %s2504_s9, %s2504_s9, %s2505_s18  }
 0x2b5 PF: > { %s1504_s20 = sand.u32 1, %s2473_s12   ;;  %p3069_p2 = scmp.ne.s32.totalorder %s3056_s21, 0 }
 0x2b6   : > { %p3070_p7 = scmp.ge.s32.totalorder %s2493_s17, 2  ;;  %s1505_s11 = scalar_lea.sflag [#allocation5], %s1504_s20 }
 0x2b8   : > { %p2252_p4 = pnand %p3070_p7, %p3069_p2 }
 0x2ba   : > { %2468 = dma.done.wait (!%p2252_p4), %s1505_s11, 8192  }
 0x2bb   : > { %2470 = vsyncadd (!%p2252_p4), %s1505_s11, 4294959104  ;;  %s22_s17 = sadd.s32 1, %s2493_s17   ;;  %s3071_s12 = smov %s2477_s13 }
 0x2bc   : > { %p19_p8 = scmp.ge.s32.totalorder %s22_s17, 4   ;;  %s3072_s13 = smov %s2481_s14 }
 0x2bd   : > { %s3073_s14 = smov %s2629_s29  ;;  %s3074_s15 = smov %s2489_s16 }
 0x2be   : > { %s3075_s16 = smov %s3077_s26  ;;  %21 = sbr.rel (!%p19_p8) target bundleno = 11 (0xb), region = 101 }
 0x2c5   :  { %1510 = vsyncpa [#allocation4], 1 }
 0x2c6   :  { %1512 = vsyncpa [#allocation4 + $0x1], 1 }
 0x2c7   :  { %1513 = vsyncpa [#allocation7], 1 }
 0x2c8   :  { %1515 = vsyncpa [#allocation7 + $0x1], 1 }
 0x2c9   :  { %1516 = vsyncpa [#allocation5], 1 }
 0x2ca   :  { %1518 = vsyncpa [#allocation5 + $0x1], 1 }

</bundles_post_ra>
